<compile_context>
chip_gen: v6e
topology: v6e:2x2x1
jax: 0.10.0
libtpu: 0.0.40
codegen_flags: <defaults>
</compile_context>

<pallas_src>
import functools
import math

import jax
import jax.numpy as jnp
from jax import lax
from jax.experimental import pallas as pl
from jax.experimental.pallas import tpu as pltpu

EPS = 1e-6
NEG_INF_FILL = -1000000000.0  # matches masked_fill_(mask == 0, -1e9)


# ------------------------------- kernel helpers --------------------------------

def _layernorm(x, alpha, bias):
    # torch: mean / unbiased std (ddof=1), scalar alpha & bias, divide by (std + eps).
    # Exact path (no approx reciprocal) per review's correctness note.
    d = x.shape[-1]
    mean = jnp.mean(x, axis=-1, keepdims=True)
    xc = x - mean
    var = jnp.sum(xc * xc, axis=-1, keepdims=True) * (1.0 / (d - 1))
    std = jnp.sqrt(var)
    return alpha * (xc / (std + EPS)) + bias


def _heads_project(x3, w_ref, bb, h, compute_dtype):
    """Head-batched projection: (bb, S, D) x (h, D, F) -> (bb*h, S, F) f32.

    Produces Q/K/V already in head-major (leading batch) layout, so no per-head
    lane slicing / stacking is needed downstream.  bb copies of the (small) per-head
    weights are materialized; at realistic sizes use batch_block=1 so bb == 1.
    """
    S, D = x3.shape[1], x3.shape[2]
    w = w_ref[...]
    F = w.shape[-1]
    xb = jnp.broadcast_to(x3.astype(compute_dtype)[:, None], (bb, h, S, D)).reshape(bb * h, S, D)
    wb = jnp.broadcast_to(w[None], (bb, h, D, F)).reshape(bb * h, D, F)
    return jnp.einsum('bsd,bdf->bsf', xb, wb, preferred_element_type=jnp.float32)


def _attention(q, k, v, bias4, wo_ref, bb, h, compute_dtype):
    """q: (bb*h, Sq, d_k), k/v: (bb*h, Skv, d_k) f32; bias4 broadcastable to (bb,h,Sq,Skv).

    Returns (bb, Sq, D) f32 with Wo folded per head (no head concat).
    """
    d_k = q.shape[-1]
    Sq = q.shape[1]
    Skv = k.shape[1]
    scale = 1.0 / math.sqrt(d_k)

    s = jnp.einsum('bqd,bkd->bqk', q.astype(compute_dtype), k.astype(compute_dtype),
                   preferred_element_type=jnp.float32) * scale                 # (bb*h, Sq, Skv)
    # additive mask bias applied once for all heads (leading-dim reshape is layout-free)
    s = (s.reshape(bb, h, Sq, Skv) + bias4).reshape(bb * h, Sq, Skv)

    s = s - jnp.max(s, axis=-1, keepdims=True)
    p = jnp.exp(s)
    # approx reciprocal kept ONLY here (EUP slot; ~2^-12 rel err on the denominator).
    p = p * pl.reciprocal(jnp.sum(p, axis=-1, keepdims=True), approx=True)

    ctx = jnp.einsum('bqk,bkd->bqd', p.astype(compute_dtype), v.astype(compute_dtype),
                     preferred_element_type=jnp.float32)                       # (bb*h, Sq, d_k)

    wo = wo_ref[...]                                                           # (h, d_k, D)
    D = wo.shape[-1]
    wo_b = jnp.broadcast_to(wo[None], (bb, h, d_k, D)).reshape(bb * h, d_k, D)
    out = jnp.einsum('bqd,bdm->bqm', ctx.astype(compute_dtype), wo_b,
                     preferred_element_type=jnp.float32)                       # (bb*h, Sq, D)
    # fold heads: sum over h == concat(ctx_heads) @ Wo, but MXU-accumulated, no concat relayout
    return jnp.sum(out.reshape(bb, h, Sq, D), axis=1)                          # (bb, Sq, D)


# ----------------------------------- kernel ------------------------------------

def decoder_block_kernel(
    valid_ref,                                  # scalar-prefetch SMEM (B,) int32: src valid lengths
    ln_ref,                                     # SMEM (6,) f32: [a1,b1,a2,b2,a3,b3]
    x_ref, enc_ref,
    wqkv1_ref, wo1_ref,                         # self-attn: (h, D, 3*d_k), (h, d_k, D)
    wq2_ref, wkv2_ref, wo2_ref,                 # cross-attn: (h, D, d_k), (h, D, 2*d_k), (h, d_k, D)
    w1_ref, b1_ref, w2_ref, b2_ref,             # feed-forward
    o_ref,
    *, h, compute_dtype,
):
    bb, Sq, D = x_ref.shape
    Skv = enc_ref.shape[1]
    d_k = D // h
    b0 = pl.program_id(0) * bb

    x = x_ref[...].astype(jnp.float32)
    enc = enc_ref[...].astype(jnp.float32)

    a1, c1 = ln_ref[0], ln_ref[1]
    a2, c2 = ln_ref[2], ln_ref[3]
    a3, c3 = ln_ref[4], ln_ref[5]

    # ---- masks generated in-kernel (no dense mask DMA) ----
    qi = lax.broadcasted_iota(jnp.int32, (Sq, Sq), 0)
    ki = lax.broadcasted_iota(jnp.int32, (Sq, Sq), 1)
    tgt_bias = jnp.where(ki <= qi, 0.0, NEG_INF_FILL).astype(jnp.float32)[None, None]   # (1,1,Sq,Sq)

    col = lax.broadcasted_iota(jnp.int32, (1, Skv), 1)
    src_bias = jnp.concatenate(
        [jnp.where(col < valid_ref[b0 + i], 0.0, NEG_INF_FILL).astype(jnp.float32)[None, None]
         for i in range(bb)],
        axis=0)                                                                         # (bb,1,1,Skv)

    # ---- residual 0: self-attention (pre-norm), fused per-head QKV projection ----
    xn = _layernorm(x, a1, c1)
    qkv = _heads_project(xn, wqkv1_ref, bb, h, compute_dtype)           # (bb*h, Sq, 3*d_k)
    x = x + _attention(qkv[..., :d_k], qkv[..., d_k:2 * d_k], qkv[..., 2 * d_k:],
                       tgt_bias, wo1_ref, bb, h, compute_dtype)

    # ---- residual 1: cross-attention with (un-normed) encoder output ----
    xn = _layernorm(x, a2, c2)
    q = _heads_project(xn, wq2_ref, bb, h, compute_dtype)               # (bb*h, Sq, d_k)
    kv = _heads_project(enc, wkv2_ref, bb, h, compute_dtype)            # (bb*h, Skv, 2*d_k)
    x = x + _attention(q, kv[..., :d_k], kv[..., d_k:],
                       src_bias, wo2_ref, bb, h, compute_dtype)

    # ---- residual 2: feed-forward (relu); dropout = identity (eval mode) ----
    xn = _layernorm(x, a3, c3)
    xn2 = xn.reshape(bb * Sq, D).astype(compute_dtype)                  # leading-dim merge: free
    hdn = jnp.maximum(
        jnp.dot(xn2, w1_ref[...], preferred_element_type=jnp.float32) + b1_ref[...], 0.0)
    y2 = jnp.dot(hdn.astype(compute_dtype), w2_ref[...],
                 preferred_element_type=jnp.float32) + b2_ref[...]
    x = x + y2.reshape(bb, Sq, D)

    o_ref[...] = x.astype(o_ref.dtype)


# ---------------------------------- wrapper ------------------------------------

def _split_heads_in(w, h):
    # (D_in, h*d_k) -> (h, D_in, d_k)
    d_in, d_out = w.shape
    d_k = d_out // h
    return jnp.transpose(w.reshape(d_in, h, d_k), (1, 0, 2))


def _split_heads_out(w, h):
    # (h*d_k, D_out) -> (h, d_k, D_out)
    d_in, d_out = w.shape
    d_k = d_in // h
    return w.reshape(h, d_k, d_out)


def _vmem_limit_bytes():
    cap = 64 * 1024 * 1024  # conservative fallback (safe on v7x)
    try:
        info = pltpu.get_tpu_info()
        for name in ("vmem_capacity_bytes", "vmem_size_bytes"):
            v = getattr(info, name, None)
            if v:
                cap = int(v)
                break
    except Exception:
        pass
    # ~3/4 of physical: ~48 MiB on v7x, ~96 MiB on v5e/v6e (per review: gen-dependent).
    return int(min(cap * 3 // 4, 112 * 1024 * 1024))


def decoder_block(x, enc, src_valid_len, params, *, h,
                  batch_block=None, compute_dtype=jnp.bfloat16):
    B, Sq, D = x.shape
    Skv = enc.shape[1]
    d_ff = params["w1"].shape[1]
    d_k = D // h

    bb = B if batch_block is None else batch_block
    assert B % bb == 0

    # Wrapper-side weight prep: per-head layout, fused QKV / KV, cast to compute dtype.
    wqkv1 = jnp.concatenate([_split_heads_in(params["wq1"], h),
                             _split_heads_in(params["wk1"], h),
                             _split_heads_in(params["wv1"], h)], axis=-1).astype(compute_dtype)
    wo1 = _split_heads_out(params["wo1"], h).astype(compute_dtype)
    wq2 = _split_heads_in(params["wq2"], h).astype(compute_dtype)
    wkv2 = jnp.concatenate([_split_heads_in(params["wk2"], h),
                            _split_heads_in(params["wv2"], h)], axis=-1).astype(compute_dtype)
    wo2 = _split_heads_out(params["wo2"], h).astype(compute_dtype)
    w1 = params["w1"].astype(compute_dtype)
    w2 = params["w2"].astype(compute_dtype)
    b1 = params["b1"].astype(jnp.float32)
    b2 = params["b2"].astype(jnp.float32)

    def full(shape):
        return pl.BlockSpec(shape, lambda b, vl: (0,) * len(shape))

    def batched(shape):
        return pl.BlockSpec((bb,) + shape, lambda b, vl: (b,) + (0,) * len(shape))

    kernel = functools.partial(decoder_block_kernel, h=h, compute_dtype=compute_dtype)

    return pl.pallas_call(
        kernel,
        out_shape=jax.ShapeDtypeStruct((B, Sq, D), x.dtype),
        grid_spec=pltpu.PrefetchScalarGridSpec(
            num_scalar_prefetch=1,                   # src_valid_len -> SMEM
            grid=(B // bb,),
            in_specs=[
                pl.BlockSpec(memory_space=pltpu.SMEM),       # layernorm scalars
                batched((Sq, D)),                            # x
                batched((Skv, D)),                           # encoder output
                full((h, D, 3 * d_k)), full((h, d_k, D)),    # self-attn
                full((h, D, d_k)), full((h, D, 2 * d_k)), full((h, d_k, D)),  # cross-attn
                full((D, d_ff)), full((1, d_ff)), full((d_ff, D)), full((1, D)),  # ffn
            ],
            out_specs=batched((Sq, D)),
        ),
        compiler_params=pltpu.CompilerParams(
            dimension_semantics=("parallel",),
            vmem_limit_bytes=_vmem_limit_bytes(),
        ),
    )(
        src_valid_len, params["ln"], x, enc,
        wqkv1, wo1, wq2, wkv2, wo2,
        w1, b1, w2, b2,
    )


# ----------------------------- pure-JAX reference ------------------------------

def _layernorm_ref(x, alpha, bias):
    mean = jnp.mean(x, axis=-1, keepdims=True)
    std = jnp.std(x, axis=-1, keepdims=True, ddof=1)
    return alpha * (x - mean) / (std + EPS) + bias


def _mha_ref(xq, xkv, mask, wq, wk, wv, wo, h):
    B, Sq, D = xq.shape
    Skv = xkv.shape[1]
    d_k = D // h
    q = (xq @ wq).reshape(B, Sq, h, d_k).transpose(0, 2, 1, 3)
    k = (xkv @ wk).reshape(B, Skv, h, d_k).transpose(0, 2, 1, 3)
    v = (xkv @ wv).reshape(B, Skv, h, d_k).transpose(0, 2, 1, 3)
    s = (q @ k.transpose(0, 1, 3, 2)) / math.sqrt(d_k)
    s = jnp.where(mask[:, None, :, :] == 0, NEG_INF_FILL, s)
    p = jax.nn.softmax(s, axis=-1)
    o = (p @ v).transpose(0, 2, 1, 3).reshape(B, Sq, D)
    return o @ wo


def decoder_block_ref(x, enc, src_mask, tgt_mask, p, *, h):
    ln = p["ln"]
    xn = _layernorm_ref(x, ln[0], ln[1])
    x = x + _mha_ref(xn, xn, tgt_mask, p["wq1"], p["wk1"], p["wv1"], p["wo1"], h)
    xn = _layernorm_ref(x, ln[2], ln[3])
    x = x + _mha_ref(xn, enc, src_mask, p["wq2"], p["wk2"], p["wv2"], p["wo2"], h)
    xn = _layernorm_ref(x, ln[4], ln[5])
    hdn = jnp.maximum(xn @ p["w1"] + p["b1"], 0.0)
    x = x + (hdn @ p["w2"] + p["b2"])
    return x


# ----------------------------------- main --------------------------------------

if __name__ == "__main__":
    B, S_TGT, S_SRC = 2, 8, 16
    D_MODEL, H, D_FF = 32, 4, 64

    key = jax.random.PRNGKey(0)
    keys = jax.random.split(key, 16)

    def w(k, shape, scale=0.05):
        return (scale * jax.random.normal(k, shape)).astype(jnp.float32)

    params = {
        "wq1": w(keys[0], (D_MODEL, D_MODEL)), "wk1": w(keys[1], (D_MODEL, D_MODEL)),
        "wv1": w(keys[2], (D_MODEL, D_MODEL)), "wo1": w(keys[3], (D_MODEL, D_MODEL)),
        "wq2": w(keys[4], (D_MODEL, D_MODEL)), "wk2": w(keys[5], (D_MODEL, D_MODEL)),
        "wv2": w(keys[6], (D_MODEL, D_MODEL)), "wo2": w(keys[7], (D_MODEL, D_MODEL)),
        "w1": w(keys[8], (D_MODEL, D_FF)), "b1": w(keys[9], (1, D_FF)),
        "w2": w(keys[10], (D_FF, D_MODEL)), "b2": w(keys[11], (1, D_MODEL)),
        # LayerNormalization params: alpha=1, bias=0 for each of the 3 norms.
        "ln": jnp.array([1.0, 0.0, 1.0, 0.0, 1.0, 0.0], dtype=jnp.float32),
    }

    x = jax.random.normal(keys[12], (B, S_TGT, D_MODEL), dtype=jnp.float32)
    enc = jax.random.normal(keys[13], (B, S_SRC, D_MODEL), dtype=jnp.float32)

    # source padding lengths (scalar-prefetched by the kernel); tgt mask is causal.
    valid_len = jnp.array([S_SRC, 12], jnp.int32)

    # kernel (bf16 MXU operands, the production path) + f32 variant for a tight check
    out = jax.block_until_ready(decoder_block(x, enc, valid_len, params, h=H))
    out_f32 = jax.block_until_ready(
        decoder_block(x, enc, valid_len, params, h=H, compute_dtype=jnp.float32))

    # dense-mask reference with identical semantics (causal tgt, padding src)
    tgt_mask = jnp.tril(jnp.ones((S_TGT, S_TGT), jnp.int32))[None].repeat(B, axis=0)
    src_mask = (jnp.arange(S_SRC)[None, None, :] < valid_len[:, None, None]).astype(jnp.int32)
    src_mask = jnp.broadcast_to(src_mask, (B, S_TGT, S_SRC))
    ref = decoder_block_ref(x, enc, src_mask, tgt_mask, params, h=H)

    assert out.shape == (B, S_TGT, D_MODEL)
    # f32 path: only the softmax approx-reciprocal differs from the reference.
    assert jnp.allclose(out_f32, ref, atol=2e-3, rtol=2e-3), "f32 kernel mismatch vs reference"
    # bf16 path: tolerance consistent with bf16 matmul operands (f32 accumulation).
    assert jnp.allclose(out, ref, atol=3e-2, rtol=3e-2), "bf16 kernel mismatch vs reference"

    print("KERNEL_OK")
</pallas_src>

<mosaic_0001>
module attributes {stable_mosaic.version = 11 : i64} {
  func.func @decoder_block_kernel(%arg0: i32, %arg1: memref<2xi32, #tpu.memory_space<smem>>, %arg2: memref<6xf32, #tpu.memory_space<smem>>, %arg3: memref<2x8x32xf32, #tpu.memory_space<vmem>>, %arg4: memref<2x16x32xf32, #tpu.memory_space<vmem>>, %arg5: memref<4x32x24xbf16, #tpu.memory_space<vmem>>, %arg6: memref<4x8x32xbf16, #tpu.memory_space<vmem>>, %arg7: memref<4x32x8xbf16, #tpu.memory_space<vmem>>, %arg8: memref<4x32x16xbf16, #tpu.memory_space<vmem>>, %arg9: memref<4x8x32xbf16, #tpu.memory_space<vmem>>, %arg10: memref<32x64xbf16, #tpu.memory_space<vmem>>, %arg11: memref<1x64xf32, #tpu.memory_space<vmem>>, %arg12: memref<64x32xbf16, #tpu.memory_space<vmem>>, %arg13: memref<1x32xf32, #tpu.memory_space<vmem>>, %arg14: memref<2x8x32xf32, #tpu.memory_space<vmem>>) attributes {dimension_semantics = [#tpu.dimension_semantics<parallel>], iteration_bounds = array<i64: 1>, scalar_prefetch = 1 : i64, scratch_operands = 0 : i64, tpu.core_type = #tpu.core_type<tc>, window_params = [{transform_indices = @transform_0, window_bounds = array<i64: 6>}, {transform_indices = @transform_1, window_bounds = array<i64: 2, 8, 32>}, {transform_indices = @transform_2, window_bounds = array<i64: 2, 16, 32>}, {pipeline_mode = #tpu.pipeline_mode<synchronous>, transform_indices = @transform_3, window_bounds = array<i64: 4, 32, 24>}, {pipeline_mode = #tpu.pipeline_mode<synchronous>, transform_indices = @transform_4, window_bounds = array<i64: 4, 8, 32>}, {pipeline_mode = #tpu.pipeline_mode<synchronous>, transform_indices = @transform_5, window_bounds = array<i64: 4, 32, 8>}, {pipeline_mode = #tpu.pipeline_mode<synchronous>, transform_indices = @transform_6, window_bounds = array<i64: 4, 32, 16>}, {pipeline_mode = #tpu.pipeline_mode<synchronous>, transform_indices = @transform_7, window_bounds = array<i64: 4, 8, 32>}, {pipeline_mode = #tpu.pipeline_mode<synchronous>, transform_indices = @transform_8, window_bounds = array<i64: 32, 64>}, {pipeline_mode = #tpu.pipeline_mode<synchronous>, transform_indices = @transform_9, window_bounds = array<i64: 1, 64>}, {pipeline_mode = #tpu.pipeline_mode<synchronous>, transform_indices = @transform_10, window_bounds = array<i64: 64, 32>}, {pipeline_mode = #tpu.pipeline_mode<synchronous>, transform_indices = @transform_11, window_bounds = array<i64: 1, 32>}, {transform_indices = @transform_12, window_bounds = array<i64: 2, 8, 32>}]} {
    %c2_i32 = arith.constant 2 : i32
    %0 = arith.muli %arg0, %c2_i32 : i32
    %c0 = arith.constant 0 : index
    %c0_0 = arith.constant 0 : index
    %c0_1 = arith.constant 0 : index
    %1 = vector.load %arg3[%c0, %c0_0, %c0_1] : memref<2x8x32xf32, #tpu.memory_space<vmem>>, vector<2x8x32xf32>
    %c0_2 = arith.constant 0 : index
    %c0_3 = arith.constant 0 : index
    %c0_4 = arith.constant 0 : index
    %2 = vector.load %arg4[%c0_2, %c0_3, %c0_4] : memref<2x16x32xf32, #tpu.memory_space<vmem>>, vector<2x16x32xf32>
    %c0_5 = arith.constant 0 : index
    %3 = memref.load %arg2[%c0_5] : memref<6xf32, #tpu.memory_space<smem>>
    %c1 = arith.constant 1 : index
    %4 = memref.load %arg2[%c1] : memref<6xf32, #tpu.memory_space<smem>>
    %c2 = arith.constant 2 : index
    %5 = memref.load %arg2[%c2] : memref<6xf32, #tpu.memory_space<smem>>
    %c3 = arith.constant 3 : index
    %6 = memref.load %arg2[%c3] : memref<6xf32, #tpu.memory_space<smem>>
    %c4 = arith.constant 4 : index
    %7 = memref.load %arg2[%c4] : memref<6xf32, #tpu.memory_space<smem>>
    %c5 = arith.constant 5 : index
    %8 = memref.load %arg2[%c5] : memref<6xf32, #tpu.memory_space<smem>>
    %9 = tpu.iota {dimensions = array<i32: 0>} : vector<8x8xi32>
    %10 = tpu.iota {dimensions = array<i32: 1>} : vector<8x8xi32>
    %11 = arith.cmpi sle, %10, %9 : vector<8x8xi32>
    %cst = arith.constant 0.000000e+00 : f32
    %cst_6 = arith.constant -1.000000e+09 : f32
    %12 = vector.broadcast %cst : f32 to vector<8x8xf32>
    %13 = vector.broadcast %cst_6 : f32 to vector<8x8xf32>
    %14 = arith.select %11, %12, %13 : vector<8x8xi1>, vector<8x8xf32>
    %15 = vector.shape_cast %14 : vector<8x8xf32> to vector<1x1x8x8xf32>
    %16 = tpu.iota {dimensions = array<i32: 1>} : vector<1x16xi32>
    %c0_i32 = arith.constant 0 : i32
    %17 = arith.addi %0, %c0_i32 : i32
    %18 = arith.index_cast %17 : i32 to index
    %19 = memref.load %arg1[%18] : memref<2xi32, #tpu.memory_space<smem>>
    %20 = vector.broadcast %19 : i32 to vector<1x16xi32>
    %21 = arith.cmpi slt, %16, %20 : vector<1x16xi32>
    %cst_7 = arith.constant 0.000000e+00 : f32
    %cst_8 = arith.constant -1.000000e+09 : f32
    %22 = vector.broadcast %cst_7 : f32 to vector<1x16xf32>
    %23 = vector.broadcast %cst_8 : f32 to vector<1x16xf32>
    %24 = arith.select %21, %22, %23 : vector<1x16xi1>, vector<1x16xf32>
    %25 = vector.shape_cast %24 : vector<1x16xf32> to vector<1x1x1x16xf32>
    %c1_i32 = arith.constant 1 : i32
    %26 = arith.addi %0, %c1_i32 : i32
    %27 = arith.index_cast %26 : i32 to index
    %28 = memref.load %arg1[%27] : memref<2xi32, #tpu.memory_space<smem>>
    %29 = vector.broadcast %28 : i32 to vector<1x16xi32>
    %30 = arith.cmpi slt, %16, %29 : vector<1x16xi32>
    %cst_9 = arith.constant 0.000000e+00 : f32
    %cst_10 = arith.constant -1.000000e+09 : f32
    %31 = vector.broadcast %cst_9 : f32 to vector<1x16xf32>
    %32 = vector.broadcast %cst_10 : f32 to vector<1x16xf32>
    %33 = arith.select %30, %31, %32 : vector<1x16xi1>, vector<1x16xf32>
    %34 = vector.shape_cast %33 : vector<1x16xf32> to vector<1x1x1x16xf32>
    %35 = tpu.concatenate %25, %34 in 0 : vector<1x1x1x16xf32>, vector<1x1x1x16xf32> -> vector<2x1x1x16xf32>
    %cst_11 = arith.constant dense<0.000000e+00> : vector<2x8xf32>
    %36 = vector.multi_reduction <add>, %1, %cst_11 [2] : vector<2x8x32xf32> to vector<2x8xf32>
    %37 = vector.shape_cast %36 : vector<2x8xf32> to vector<2x8x1xf32>
    %cst_12 = arith.constant 3.200000e+01 : f32
    %38 = vector.broadcast %cst_12 : f32 to vector<2x8x1xf32>
    %39 = arith.divf %37, %38 : vector<2x8x1xf32>
    %40 = vector.broadcast %39 : vector<2x8x1xf32> to vector<2x8x32xf32>
    %41 = arith.subf %1, %40 : vector<2x8x32xf32>
    %42 = arith.mulf %41, %41 : vector<2x8x32xf32>
    %cst_13 = arith.constant dense<0.000000e+00> : vector<2x8xf32>
    %43 = vector.multi_reduction <add>, %42, %cst_13 [2] : vector<2x8x32xf32> to vector<2x8xf32>
    %44 = vector.shape_cast %43 : vector<2x8xf32> to vector<2x8x1xf32>
    %cst_14 = arith.constant 0.0322580636 : f32
    %45 = vector.broadcast %cst_14 : f32 to vector<2x8x1xf32>
    %46 = arith.mulf %44, %45 : vector<2x8x1xf32>
    %47 = math.sqrt %46 : vector<2x8x1xf32>
    %cst_15 = arith.constant 9.99999997E-7 : f32
    %48 = vector.broadcast %cst_15 : f32 to vector<2x8x1xf32>
    %49 = arith.addf %47, %48 : vector<2x8x1xf32>
    %50 = vector.broadcast %49 : vector<2x8x1xf32> to vector<2x8x32xf32>
    %51 = arith.divf %41, %50 : vector<2x8x32xf32>
    %52 = vector.broadcast %3 : f32 to vector<2x8x32xf32>
    %53 = arith.mulf %52, %51 : vector<2x8x32xf32>
    %54 = vector.broadcast %4 : f32 to vector<2x8x32xf32>
    %55 = arith.addf %53, %54 : vector<2x8x32xf32>
    %c0_16 = arith.constant 0 : index
    %c0_17 = arith.constant 0 : index
    %c0_18 = arith.constant 0 : index
    %56 = vector.load %arg5[%c0_16, %c0_17, %c0_18] : memref<4x32x24xbf16, #tpu.memory_space<vmem>>, vector<4x32x24xbf16>
    %57 = arith.truncf %55 : vector<2x8x32xf32> to vector<2x8x32xbf16>
    %58 = vector.shape_cast %57 : vector<2x8x32xbf16> to vector<2x1x8x32xbf16>
    %59 = vector.shape_cast %58 : vector<2x1x8x32xbf16> to vector<2x1x8x32xbf16>
    %60 = vector.broadcast %59 : vector<2x1x8x32xbf16> to vector<2x4x8x32xbf16>
    %61 = vector.shape_cast %60 : vector<2x4x8x32xbf16> to vector<8x8x32xbf16>
    %62 = vector.shape_cast %56 : vector<4x32x24xbf16> to vector<1x4x32x24xbf16>
    %63 = vector.shape_cast %62 : vector<1x4x32x24xbf16> to vector<1x4x32x24xbf16>
    %64 = vector.broadcast %63 : vector<1x4x32x24xbf16> to vector<2x4x32x24xbf16>
    %65 = vector.shape_cast %64 : vector<2x4x32x24xbf16> to vector<8x32x24xbf16>
    "tpu.trace_start"() <{level = 10 : i32, message = "bsd,bdf->bsf"}> : () -> ()
    %cst_19 = arith.constant dense<0.000000e+00> : vector<8x8x24xf32>
    %66 = tpu.matmul %61, %65, %cst_19 {dimension_numbers = #tpu.dot_dimension_numbers<[2], [1], [1], [2], [0, 0, 0, 1, 1, 2], [0], [0]>} : vector<8x8x32xbf16>, vector<8x32x24xbf16>, vector<8x8x24xf32> -> vector<8x8x24xf32>
    "tpu.trace_stop"() : () -> ()
    %67 = vector.extract_strided_slice %66 {offsets = [0, 0, 0], sizes = [8, 8, 8], strides = [1, 1, 1]} : vector<8x8x24xf32> to vector<8x8x8xf32>
    %68 = vector.extract_strided_slice %66 {offsets = [0, 0, 8], sizes = [8, 8, 8], strides = [1, 1, 1]} : vector<8x8x24xf32> to vector<8x8x8xf32>
    %69 = vector.extract_strided_slice %66 {offsets = [0, 0, 16], sizes = [8, 8, 8], strides = [1, 1, 1]} : vector<8x8x24xf32> to vector<8x8x8xf32>
    %70 = arith.truncf %67 : vector<8x8x8xf32> to vector<8x8x8xbf16>
    %71 = arith.truncf %68 : vector<8x8x8xf32> to vector<8x8x8xbf16>
    "tpu.trace_start"() <{level = 10 : i32, message = "bqd,bkd->bqk"}> : () -> ()
    %cst_20 = arith.constant dense<0.000000e+00> : vector<8x8x8xf32>
    %72 = tpu.matmul %70, %71, %cst_20 {dimension_numbers = #tpu.dot_dimension_numbers<[2], [2], [1], [1], [0, 0, 0, 1, 1, 1], [0], [0]>} : vector<8x8x8xbf16>, vector<8x8x8xbf16>, vector<8x8x8xf32> -> vector<8x8x8xf32>
    "tpu.trace_stop"() : () -> ()
    %cst_21 = arith.constant 0.353553385 : f32
    %73 = vector.broadcast %cst_21 : f32 to vector<8x8x8xf32>
    %74 = arith.mulf %72, %73 : vector<8x8x8xf32>
    %75 = vector.shape_cast %74 : vector<8x8x8xf32> to vector<2x4x8x8xf32>
    %76 = vector.broadcast %15 : vector<1x1x8x8xf32> to vector<2x4x8x8xf32>
    %77 = arith.addf %75, %76 : vector<2x4x8x8xf32>
    %78 = vector.shape_cast %77 : vector<2x4x8x8xf32> to vector<8x8x8xf32>
    %cst_22 = arith.constant dense<0xFF800000> : vector<8x8xf32>
    %79 = vector.multi_reduction <maximumf>, %78, %cst_22 [2] : vector<8x8x8xf32> to vector<8x8xf32>
    %80 = vector.shape_cast %79 : vector<8x8xf32> to vector<8x8x1xf32>
    %81 = vector.broadcast %80 : vector<8x8x1xf32> to vector<8x8x8xf32>
    %82 = arith.subf %78, %81 : vector<8x8x8xf32>
    %83 = math.exp %82 : vector<8x8x8xf32>
    %cst_23 = arith.constant dense<0.000000e+00> : vector<8x8xf32>
    %84 = vector.multi_reduction <add>, %83, %cst_23 [2] : vector<8x8x8xf32> to vector<8x8xf32>
    %85 = vector.shape_cast %84 : vector<8x8xf32> to vector<8x8x1xf32>
    %86 = tpu.reciprocal %85 {approx = true} : vector<8x8x1xf32> -> vector<8x8x1xf32>
    %87 = vector.broadcast %86 : vector<8x8x1xf32> to vector<8x8x8xf32>
    %88 = arith.mulf %83, %87 : vector<8x8x8xf32>
    %89 = arith.truncf %88 : vector<8x8x8xf32> to vector<8x8x8xbf16>
    %90 = arith.truncf %69 : vector<8x8x8xf32> to vector<8x8x8xbf16>
    "tpu.trace_start"() <{level = 10 : i32, message = "bqk,bkd->bqd"}> : () -> ()
    %cst_24 = arith.constant dense<0.000000e+00> : vector<8x8x8xf32>
    %91 = tpu.matmul %89, %90, %cst_24 {dimension_numbers = #tpu.dot_dimension_numbers<[2], [1], [1], [2], [0, 0, 0, 1, 1, 2], [0], [0]>} : vector<8x8x8xbf16>, vector<8x8x8xbf16>, vector<8x8x8xf32> -> vector<8x8x8xf32>
    "tpu.trace_stop"() : () -> ()
    %c0_25 = arith.constant 0 : index
    %c0_26 = arith.constant 0 : index
    %c0_27 = arith.constant 0 : index
    %92 = vector.load %arg6[%c0_25, %c0_26, %c0_27] : memref<4x8x32xbf16, #tpu.memory_space<vmem>>, vector<4x8x32xbf16>
    %93 = vector.shape_cast %92 : vector<4x8x32xbf16> to vector<1x4x8x32xbf16>
    %94 = vector.shape_cast %93 : vector<1x4x8x32xbf16> to vector<1x4x8x32xbf16>
    %95 = vector.broadcast %94 : vector<1x4x8x32xbf16> to vector<2x4x8x32xbf16>
    %96 = vector.shape_cast %95 : vector<2x4x8x32xbf16> to vector<8x8x32xbf16>
    %97 = arith.truncf %91 : vector<8x8x8xf32> to vector<8x8x8xbf16>
    "tpu.trace_start"() <{level = 10 : i32, message = "bqd,bdm->bqm"}> : () -> ()
    %cst_28 = arith.constant dense<0.000000e+00> : vector<8x8x32xf32>
    %98 = tpu.matmul %97, %96, %cst_28 {dimension_numbers = #tpu.dot_dimension_numbers<[2], [1], [1], [2], [0, 0, 0, 1, 1, 2], [0], [0]>} : vector<8x8x8xbf16>, vector<8x8x32xbf16>, vector<8x8x32xf32> -> vector<8x8x32xf32>
    "tpu.trace_stop"() : () -> ()
    %99 = vector.shape_cast %98 : vector<8x8x32xf32> to vector<2x4x8x32xf32>
    %cst_29 = arith.constant dense<0.000000e+00> : vector<2x8x32xf32>
    %100 = vector.multi_reduction <add>, %99, %cst_29 [1] : vector<2x4x8x32xf32> to vector<2x8x32xf32>
    %101 = arith.addf %1, %100 : vector<2x8x32xf32>
    %cst_30 = arith.constant dense<0.000000e+00> : vector<2x8xf32>
    %102 = vector.multi_reduction <add>, %101, %cst_30 [2] : vector<2x8x32xf32> to vector<2x8xf32>
    %103 = vector.shape_cast %102 : vector<2x8xf32> to vector<2x8x1xf32>
    %cst_31 = arith.constant 3.200000e+01 : f32
    %104 = vector.broadcast %cst_31 : f32 to vector<2x8x1xf32>
    %105 = arith.divf %103, %104 : vector<2x8x1xf32>
    %106 = vector.broadcast %105 : vector<2x8x1xf32> to vector<2x8x32xf32>
    %107 = arith.subf %101, %106 : vector<2x8x32xf32>
    %108 = arith.mulf %107, %107 : vector<2x8x32xf32>
    %cst_32 = arith.constant dense<0.000000e+00> : vector<2x8xf32>
    %109 = vector.multi_reduction <add>, %108, %cst_32 [2] : vector<2x8x32xf32> to vector<2x8xf32>
    %110 = vector.shape_cast %109 : vector<2x8xf32> to vector<2x8x1xf32>
    %cst_33 = arith.constant 0.0322580636 : f32
    %111 = vector.broadcast %cst_33 : f32 to vector<2x8x1xf32>
    %112 = arith.mulf %110, %111 : vector<2x8x1xf32>
    %113 = math.sqrt %112 : vector<2x8x1xf32>
    %cst_34 = arith.constant 9.99999997E-7 : f32
    %114 = vector.broadcast %cst_34 : f32 to vector<2x8x1xf32>
    %115 = arith.addf %113, %114 : vector<2x8x1xf32>
    %116 = vector.broadcast %115 : vector<2x8x1xf32> to vector<2x8x32xf32>
    %117 = arith.divf %107, %116 : vector<2x8x32xf32>
    %118 = vector.broadcast %5 : f32 to vector<2x8x32xf32>
    %119 = arith.mulf %118, %117 : vector<2x8x32xf32>
    %120 = vector.broadcast %6 : f32 to vector<2x8x32xf32>
    %121 = arith.addf %119, %120 : vector<2x8x32xf32>
    %c0_35 = arith.constant 0 : index
    %c0_36 = arith.constant 0 : index
    %c0_37 = arith.constant 0 : index
    %122 = vector.load %arg7[%c0_35, %c0_36, %c0_37] : memref<4x32x8xbf16, #tpu.memory_space<vmem>>, vector<4x32x8xbf16>
    %123 = arith.truncf %121 : vector<2x8x32xf32> to vector<2x8x32xbf16>
    %124 = vector.shape_cast %123 : vector<2x8x32xbf16> to vector<2x1x8x32xbf16>
    %125 = vector.shape_cast %124 : vector<2x1x8x32xbf16> to vector<2x1x8x32xbf16>
    %126 = vector.broadcast %125 : vector<2x1x8x32xbf16> to vector<2x4x8x32xbf16>
    %127 = vector.shape_cast %126 : vector<2x4x8x32xbf16> to vector<8x8x32xbf16>
    %128 = vector.shape_cast %122 : vector<4x32x8xbf16> to vector<1x4x32x8xbf16>
    %129 = vector.shape_cast %128 : vector<1x4x32x8xbf16> to vector<1x4x32x8xbf16>
    %130 = vector.broadcast %129 : vector<1x4x32x8xbf16> to vector<2x4x32x8xbf16>
    %131 = vector.shape_cast %130 : vector<2x4x32x8xbf16> to vector<8x32x8xbf16>
    "tpu.trace_start"() <{level = 10 : i32, message = "bsd,bdf->bsf"}> : () -> ()
    %cst_38 = arith.constant dense<0.000000e+00> : vector<8x8x8xf32>
    %132 = tpu.matmul %127, %131, %cst_38 {dimension_numbers = #tpu.dot_dimension_numbers<[2], [1], [1], [2], [0, 0, 0, 1, 1, 2], [0], [0]>} : vector<8x8x32xbf16>, vector<8x32x8xbf16>, vector<8x8x8xf32> -> vector<8x8x8xf32>
    "tpu.trace_stop"() : () -> ()
    %c0_39 = arith.constant 0 : index
    %c0_40 = arith.constant 0 : index
    %c0_41 = arith.constant 0 : index
    %133 = vector.load %arg8[%c0_39, %c0_40, %c0_41] : memref<4x32x16xbf16, #tpu.memory_space<vmem>>, vector<4x32x16xbf16>
    %134 = arith.truncf %2 : vector<2x16x32xf32> to vector<2x16x32xbf16>
    %135 = vector.shape_cast %134 : vector<2x16x32xbf16> to vector<2x1x16x32xbf16>
    %136 = vector.shape_cast %135 : vector<2x1x16x32xbf16> to vector<2x1x16x32xbf16>
    %137 = vector.broadcast %136 : vector<2x1x16x32xbf16> to vector<2x4x16x32xbf16>
    %138 = vector.shape_cast %137 : vector<2x4x16x32xbf16> to vector<8x16x32xbf16>
    %139 = vector.shape_cast %133 : vector<4x32x16xbf16> to vector<1x4x32x16xbf16>
    %140 = vector.shape_cast %139 : vector<1x4x32x16xbf16> to vector<1x4x32x16xbf16>
    %141 = vector.broadcast %140 : vector<1x4x32x16xbf16> to vector<2x4x32x16xbf16>
    %142 = vector.shape_cast %141 : vector<2x4x32x16xbf16> to vector<8x32x16xbf16>
    "tpu.trace_start"() <{level = 10 : i32, message = "bsd,bdf->bsf"}> : () -> ()
    %cst_42 = arith.constant dense<0.000000e+00> : vector<8x16x16xf32>
    %143 = tpu.matmul %138, %142, %cst_42 {dimension_numbers = #tpu.dot_dimension_numbers<[2], [1], [1], [2], [0, 0, 0, 1, 1, 2], [0], [0]>} : vector<8x16x32xbf16>, vector<8x32x16xbf16>, vector<8x16x16xf32> -> vector<8x16x16xf32>
    "tpu.trace_stop"() : () -> ()
    %144 = vector.extract_strided_slice %143 {offsets = [0, 0, 0], sizes = [8, 16, 8], strides = [1, 1, 1]} : vector<8x16x16xf32> to vector<8x16x8xf32>
    %145 = vector.extract_strided_slice %143 {offsets = [0, 0, 8], sizes = [8, 16, 8], strides = [1, 1, 1]} : vector<8x16x16xf32> to vector<8x16x8xf32>
    %146 = arith.truncf %132 : vector<8x8x8xf32> to vector<8x8x8xbf16>
    %147 = arith.truncf %144 : vector<8x16x8xf32> to vector<8x16x8xbf16>
    "tpu.trace_start"() <{level = 10 : i32, message = "bqd,bkd->bqk"}> : () -> ()
    %cst_43 = arith.constant dense<0.000000e+00> : vector<8x8x16xf32>
    %148 = tpu.matmul %146, %147, %cst_43 {dimension_numbers = #tpu.dot_dimension_numbers<[2], [2], [1], [1], [0, 0, 0, 1, 1, 1], [0], [0]>} : vector<8x8x8xbf16>, vector<8x16x8xbf16>, vector<8x8x16xf32> -> vector<8x8x16xf32>
    "tpu.trace_stop"() : () -> ()
    %cst_44 = arith.constant 0.353553385 : f32
    %149 = vector.broadcast %cst_44 : f32 to vector<8x8x16xf32>
    %150 = arith.mulf %148, %149 : vector<8x8x16xf32>
    %151 = vector.shape_cast %150 : vector<8x8x16xf32> to vector<2x4x8x16xf32>
    %152 = vector.broadcast %35 : vector<2x1x1x16xf32> to vector<2x4x8x16xf32>
    %153 = arith.addf %151, %152 : vector<2x4x8x16xf32>
    %154 = vector.shape_cast %153 : vector<2x4x8x16xf32> to vector<8x8x16xf32>
    %cst_45 = arith.constant dense<0xFF800000> : vector<8x8xf32>
    %155 = vector.multi_reduction <maximumf>, %154, %cst_45 [2] : vector<8x8x16xf32> to vector<8x8xf32>
    %156 = vector.shape_cast %155 : vector<8x8xf32> to vector<8x8x1xf32>
    %157 = vector.broadcast %156 : vector<8x8x1xf32> to vector<8x8x16xf32>
    %158 = arith.subf %154, %157 : vector<8x8x16xf32>
    %159 = math.exp %158 : vector<8x8x16xf32>
    %cst_46 = arith.constant dense<0.000000e+00> : vector<8x8xf32>
    %160 = vector.multi_reduction <add>, %159, %cst_46 [2] : vector<8x8x16xf32> to vector<8x8xf32>
    %161 = vector.shape_cast %160 : vector<8x8xf32> to vector<8x8x1xf32>
    %162 = tpu.reciprocal %161 {approx = true} : vector<8x8x1xf32> -> vector<8x8x1xf32>
    %163 = vector.broadcast %162 : vector<8x8x1xf32> to vector<8x8x16xf32>
    %164 = arith.mulf %159, %163 : vector<8x8x16xf32>
    %165 = arith.truncf %164 : vector<8x8x16xf32> to vector<8x8x16xbf16>
    %166 = arith.truncf %145 : vector<8x16x8xf32> to vector<8x16x8xbf16>
    "tpu.trace_start"() <{level = 10 : i32, message = "bqk,bkd->bqd"}> : () -> ()
    %cst_47 = arith.constant dense<0.000000e+00> : vector<8x8x8xf32>
    %167 = tpu.matmul %165, %166, %cst_47 {dimension_numbers = #tpu.dot_dimension_numbers<[2], [1], [1], [2], [0, 0, 0, 1, 1, 2], [0], [0]>} : vector<8x8x16xbf16>, vector<8x16x8xbf16>, vector<8x8x8xf32> -> vector<8x8x8xf32>
    "tpu.trace_stop"() : () -> ()
    %c0_48 = arith.constant 0 : index
    %c0_49 = arith.constant 0 : index
    %c0_50 = arith.constant 0 : index
    %168 = vector.load %arg9[%c0_48, %c0_49, %c0_50] : memref<4x8x32xbf16, #tpu.memory_space<vmem>>, vector<4x8x32xbf16>
    %169 = vector.shape_cast %168 : vector<4x8x32xbf16> to vector<1x4x8x32xbf16>
    %170 = vector.shape_cast %169 : vector<1x4x8x32xbf16> to vector<1x4x8x32xbf16>
    %171 = vector.broadcast %170 : vector<1x4x8x32xbf16> to vector<2x4x8x32xbf16>
    %172 = vector.shape_cast %171 : vector<2x4x8x32xbf16> to vector<8x8x32xbf16>
    %173 = arith.truncf %167 : vector<8x8x8xf32> to vector<8x8x8xbf16>
    "tpu.trace_start"() <{level = 10 : i32, message = "bqd,bdm->bqm"}> : () -> ()
    %cst_51 = arith.constant dense<0.000000e+00> : vector<8x8x32xf32>
    %174 = tpu.matmul %173, %172, %cst_51 {dimension_numbers = #tpu.dot_dimension_numbers<[2], [1], [1], [2], [0, 0, 0, 1, 1, 2], [0], [0]>} : vector<8x8x8xbf16>, vector<8x8x32xbf16>, vector<8x8x32xf32> -> vector<8x8x32xf32>
    "tpu.trace_stop"() : () -> ()
    %175 = vector.shape_cast %174 : vector<8x8x32xf32> to vector<2x4x8x32xf32>
    %cst_52 = arith.constant dense<0.000000e+00> : vector<2x8x32xf32>
    %176 = vector.multi_reduction <add>, %175, %cst_52 [1] : vector<2x4x8x32xf32> to vector<2x8x32xf32>
    %177 = arith.addf %101, %176 : vector<2x8x32xf32>
    %cst_53 = arith.constant dense<0.000000e+00> : vector<2x8xf32>
    %178 = vector.multi_reduction <add>, %177, %cst_53 [2] : vector<2x8x32xf32> to vector<2x8xf32>
    %179 = vector.shape_cast %178 : vector<2x8xf32> to vector<2x8x1xf32>
    %cst_54 = arith.constant 3.200000e+01 : f32
    %180 = vector.broadcast %cst_54 : f32 to vector<2x8x1xf32>
    %181 = arith.divf %179, %180 : vector<2x8x1xf32>
    %182 = vector.broadcast %181 : vector<2x8x1xf32> to vector<2x8x32xf32>
    %183 = arith.subf %177, %182 : vector<2x8x32xf32>
    %184 = arith.mulf %183, %183 : vector<2x8x32xf32>
    %cst_55 = arith.constant dense<0.000000e+00> : vector<2x8xf32>
    %185 = vector.multi_reduction <add>, %184, %cst_55 [2] : vector<2x8x32xf32> to vector<2x8xf32>
    %186 = vector.shape_cast %185 : vector<2x8xf32> to vector<2x8x1xf32>
    %cst_56 = arith.constant 0.0322580636 : f32
    %187 = vector.broadcast %cst_56 : f32 to vector<2x8x1xf32>
    %188 = arith.mulf %186, %187 : vector<2x8x1xf32>
    %189 = math.sqrt %188 : vector<2x8x1xf32>
    %cst_57 = arith.constant 9.99999997E-7 : f32
    %190 = vector.broadcast %cst_57 : f32 to vector<2x8x1xf32>
    %191 = arith.addf %189, %190 : vector<2x8x1xf32>
    %192 = vector.broadcast %191 : vector<2x8x1xf32> to vector<2x8x32xf32>
    %193 = arith.divf %183, %192 : vector<2x8x32xf32>
    %194 = vector.broadcast %7 : f32 to vector<2x8x32xf32>
    %195 = arith.mulf %194, %193 : vector<2x8x32xf32>
    %196 = vector.broadcast %8 : f32 to vector<2x8x32xf32>
    %197 = arith.addf %195, %196 : vector<2x8x32xf32>
    %198 = vector.shape_cast %197 : vector<2x8x32xf32> to vector<16x32xf32>
    %199 = arith.truncf %198 : vector<16x32xf32> to vector<16x32xbf16>
    %c0_58 = arith.constant 0 : index
    %c0_59 = arith.constant 0 : index
    %200 = vector.load %arg10[%c0_58, %c0_59] : memref<32x64xbf16, #tpu.memory_space<vmem>>, vector<32x64xbf16>
    %cst_60 = arith.constant dense<0.000000e+00> : vector<16x64xf32>
    %201 = tpu.matmul %199, %200, %cst_60 {dimension_numbers = #tpu.dot_dimension_numbers<[1], [0], [0], [1], [0, 0, 1, 1], [], []>} : vector<16x32xbf16>, vector<32x64xbf16>, vector<16x64xf32> -> vector<16x64xf32>
    %c0_61 = arith.constant 0 : index
    %c0_62 = arith.constant 0 : index
    %202 = vector.load %arg11[%c0_61, %c0_62] : memref<1x64xf32, #tpu.memory_space<vmem>>, vector<1x64xf32>
    %203 = vector.broadcast %202 : vector<1x64xf32> to vector<16x64xf32>
    %204 = arith.addf %201, %203 : vector<16x64xf32>
    %cst_63 = arith.constant 0.000000e+00 : f32
    %205 = vector.broadcast %cst_63 : f32 to vector<16x64xf32>
    %206 = arith.maximumf %204, %205 : vector<16x64xf32>
    %207 = arith.truncf %206 : vector<16x64xf32> to vector<16x64xbf16>
    %c0_64 = arith.constant 0 : index
    %c0_65 = arith.constant 0 : index
    %208 = vector.load %arg12[%c0_64, %c0_65] : memref<64x32xbf16, #tpu.memory_space<vmem>>, vector<64x32xbf16>
    %cst_66 = arith.constant dense<0.000000e+00> : vector<16x32xf32>
    %209 = tpu.matmul %207, %208, %cst_66 {dimension_numbers = #tpu.dot_dimension_numbers<[1], [0], [0], [1], [0, 0, 1, 1], [], []>} : vector<16x64xbf16>, vector<64x32xbf16>, vector<16x32xf32> -> vector<16x32xf32>
    %c0_67 = arith.constant 0 : index
    %c0_68 = arith.constant 0 : index
    %210 = vector.load %arg13[%c0_67, %c0_68] : memref<1x32xf32, #tpu.memory_space<vmem>>, vector<1x32xf32>
    %211 = vector.broadcast %210 : vector<1x32xf32> to vector<16x32xf32>
    %212 = arith.addf %209, %211 : vector<16x32xf32>
    %213 = vector.shape_cast %212 : vector<16x32xf32> to vector<2x8x32xf32>
    %214 = arith.addf %177, %213 : vector<2x8x32xf32>
    %c0_69 = arith.constant 0 : index
    %c0_70 = arith.constant 0 : index
    %c0_71 = arith.constant 0 : index
    %215 = vector.load %arg14[%c0_69, %c0_70, %c0_71] : memref<2x8x32xf32, #tpu.memory_space<vmem>>, vector<2x8x32xf32>
    tpu.vector_store %arg14[%c0_69, %c0_70, %c0_71], %214 {strides = array<i32>} : memref<2x8x32xf32, #tpu.memory_space<vmem>>, vector<2x8x32xf32>,
    return
  }
  func.func @transform_0(%arg0: i32, %arg1: memref<2xi32, #tpu.memory_space<smem>>) -> i32 {
    %c0_i32 = arith.constant 0 : i32
    %c0_i32_0 = arith.constant 0 : i32
    return %c0_i32 : i32
  }
  func.func @transform_1(%arg0: i32, %arg1: memref<2xi32, #tpu.memory_space<smem>>) -> (i32, i32, i32) {
    %c0_i32 = arith.constant 0 : i32
    %c0_i32_0 = arith.constant 0 : i32
    %c0_i32_1 = arith.constant 0 : i32
    return %arg0, %c0_i32, %c0_i32_0 : i32, i32, i32
  }
  func.func @transform_2(%arg0: i32, %arg1: memref<2xi32, #tpu.memory_space<smem>>) -> (i32, i32, i32) {
    %c0_i32 = arith.constant 0 : i32
    %c0_i32_0 = arith.constant 0 : i32
    %c0_i32_1 = arith.constant 0 : i32
    return %arg0, %c0_i32, %c0_i32_0 : i32, i32, i32
  }
  func.func @transform_3(%arg0: i32, %arg1: memref<2xi32, #tpu.memory_space<smem>>) -> (i32, i32, i32) {
    %c0_i32 = arith.constant 0 : i32
    %c0_i32_0 = arith.constant 0 : i32
    %c0_i32_1 = arith.constant 0 : i32
    %c0_i32_2 = arith.constant 0 : i32
    return %c0_i32, %c0_i32_0, %c0_i32_1 : i32, i32, i32
  }
  func.func @transform_4(%arg0: i32, %arg1: memref<2xi32, #tpu.memory_space<smem>>) -> (i32, i32, i32) {
    %c0_i32 = arith.constant 0 : i32
    %c0_i32_0 = arith.constant 0 : i32
    %c0_i32_1 = arith.constant 0 : i32
    %c0_i32_2 = arith.constant 0 : i32
    return %c0_i32, %c0_i32_0, %c0_i32_1 : i32, i32, i32
  }
  func.func @transform_5(%arg0: i32, %arg1: memref<2xi32, #tpu.memory_space<smem>>) -> (i32, i32, i32) {
    %c0_i32 = arith.constant 0 : i32
    %c0_i32_0 = arith.constant 0 : i32
    %c0_i32_1 = arith.constant 0 : i32
    %c0_i32_2 = arith.constant 0 : i32
    return %c0_i32, %c0_i32_0, %c0_i32_1 : i32, i32, i32
  }
  func.func @transform_6(%arg0: i32, %arg1: memref<2xi32, #tpu.memory_space<smem>>) -> (i32, i32, i32) {
    %c0_i32 = arith.constant 0 : i32
    %c0_i32_0 = arith.constant 0 : i32
    %c0_i32_1 = arith.constant 0 : i32
    %c0_i32_2 = arith.constant 0 : i32
    return %c0_i32, %c0_i32_0, %c0_i32_1 : i32, i32, i32
  }
  func.func @transform_7(%arg0: i32, %arg1: memref<2xi32, #tpu.memory_space<smem>>) -> (i32, i32, i32) {
    %c0_i32 = arith.constant 0 : i32
    %c0_i32_0 = arith.constant 0 : i32
    %c0_i32_1 = arith.constant 0 : i32
    %c0_i32_2 = arith.constant 0 : i32
    return %c0_i32, %c0_i32_0, %c0_i32_1 : i32, i32, i32
  }
  func.func @transform_8(%arg0: i32, %arg1: memref<2xi32, #tpu.memory_space<smem>>) -> (i32, i32) {
    %c0_i32 = arith.constant 0 : i32
    %c0_i32_0 = arith.constant 0 : i32
    %c0_i32_1 = arith.constant 0 : i32
    return %c0_i32, %c0_i32_0 : i32, i32
  }
  func.func @transform_9(%arg0: i32, %arg1: memref<2xi32, #tpu.memory_space<smem>>) -> (i32, i32) {
    %c0_i32 = arith.constant 0 : i32
    %c0_i32_0 = arith.constant 0 : i32
    %c0_i32_1 = arith.constant 0 : i32
    return %c0_i32, %c0_i32_0 : i32, i32
  }
  func.func @transform_10(%arg0: i32, %arg1: memref<2xi32, #tpu.memory_space<smem>>) -> (i32, i32) {
    %c0_i32 = arith.constant 0 : i32
    %c0_i32_0 = arith.constant 0 : i32
    %c0_i32_1 = arith.constant 0 : i32
    return %c0_i32, %c0_i32_0 : i32, i32
  }
  func.func @transform_11(%arg0: i32, %arg1: memref<2xi32, #tpu.memory_space<smem>>) -> (i32, i32) {
    %c0_i32 = arith.constant 0 : i32
    %c0_i32_0 = arith.constant 0 : i32
    %c0_i32_1 = arith.constant 0 : i32
    return %c0_i32, %c0_i32_0 : i32, i32
  }
  func.func @transform_12(%arg0: i32, %arg1: memref<2xi32, #tpu.memory_space<smem>>) -> (i32, i32, i32) {
    %c0_i32 = arith.constant 0 : i32
    %c0_i32_0 = arith.constant 0 : i32
    %c0_i32_1 = arith.constant 0 : i32
    return %arg0, %c0_i32, %c0_i32_0 : i32, i32, i32
  }
}

</mosaic_0001>

<bundles_post_ra>
// kernel: tpu_custom_call.1
= control target key start
LH: loop header
LB: loop body
LE: loop exit
PB: predicated region body
PF: predicated region fallthrough
CT: control target
= control target key end

     0   :  { %s6061_s0 = inlined_call_operand.vmem [shape: s32[2], index: 0, kind: input, shape index: {}]   ;;  %s6062_s1 = inlined_call_operand.vmem [shape: f32[6], index: 1, kind: input, shape index: {}]   ;;  %s6063_s2 = inlined_call_operand.vmem [shape: f32[2,8,32], index: 2, kind: input, shape index: {}]   ;;  %s6064_s3 = inlined_call_operand.vmem [shape: f32[2,16,32], index: 3, kind: input, shape index: {}]   ;;  %s6065_s4 = inlined_call_operand.vmem [shape: bf16[4,32,24], index: 4, kind: input, shape index: {}]   ;;  %s6066_s5 = inlined_call_operand.vmem [shape: bf16[4,8,32], index: 5, kind: input, shape index: {}]   ;;  %s6067_s6 = inlined_call_operand.vmem [shape: bf16[4,32,8], index: 6, kind: input, shape index: {}]   ;;  %s6068_s7 = inlined_call_operand.vmem [shape: bf16[4,32,16], index: 7, kind: input, shape index: {}]   ;;  %s6069_s8 = inlined_call_operand.vmem [shape: bf16[4,8,32], index: 8, kind: input, shape index: {}]   ;;  %s6070_s9 = inlined_call_operand.vmem [shape: bf16[32,64], index: 9, kind: input, shape index: {}]   ;;  %s6071_s10 = inlined_call_operand.vmem [shape: f32[1,64], index: 10, kind: input, shape index: {}]   ;;  %s6072_s11 = inlined_call_operand.vmem [shape: bf16[64,32], index: 11, kind: input, shape index: {}]   ;;  %s6073_s12 = inlined_call_operand.vmem [shape: f32[1,32], index: 12, kind: input, shape index: {}]   ;;  %s6074_s13 = inlined_call_operand.hbm [shape: f32[2,8,32], index: 13, kind: output, shape index: {}]  }
   0x1   :  { %s18_s27 = sshll.u32 %s6061_s0, 4  ;;  %s19_s27 = int_to_ptr.vmem [resolvable:$true] %s18_s27 }
   0x2   :  { %s5056_s28 = scalar_lea.vmem %s19_s27, 16  ;;  %p5061_p1 = scmp.lt.s32.totalorder %s19_s27, %s19_s27 }
   0x3   :  { %p5057_p0 = scmp.ne.s32.totalorder %s19_s27, %s5056_s28  ;;  %p5062_p2 = scmp.lt.s32.totalorder %s5056_s28, %s5056_s28 }
   0x5   :  { %p5063_p3 = por %p5062_p2, %p5061_p1 }
   0x7   :  { %p5064_p4 = pnand %p5063_p3, %p5057_p0 }
   0x9   :  { %5067 = shalt.err (!%p5064_p4)  }
   0xa   :  { %s5106_s29 = smov [#allocation3]  }
   0xb   :  { %21 = dma.vmem_to_smem %s19_s27, 16, %s5106_s29, [#allocation2] }
   0xc   :  { %5100 = dma.done.wait [#allocation2], 16 }
   0xd   :  { %5101 = vsyncadd [#allocation2], 4294967280 }
   0xe   :  { %23 = sfence }
   0xf   :  { %24 = vsyncpa [#allocation6], 0 }
  0x10   :  { %25 = vsyncpa [#allocation5], 0  ;;  %s32_s15 = sshll.u32 %s6062_s1, 4  ;;  %s33_s15 = int_to_ptr.vmem [resolvable:$true] %s32_s15 }
  0x11   :  { %s5068_s0 = scalar_lea.vmem %s33_s15, 16  ;;  %p5073_p6 = scmp.lt.s32.totalorder %s33_s15, %s33_s15 }
  0x12   :  { %p5069_p5 = scmp.ne.s32.totalorder %s33_s15, %s5068_s0  ;;  %p5074_p7 = scmp.lt.s32.totalorder %s5068_s0, %s5068_s0 }
  0x14   :  { %p5075_p8 = por %p5074_p7, %p5073_p6 }
  0x16   :  { %p5076_p9 = pnand %p5075_p8, %p5069_p5 }
  0x18   :  { %5079 = shalt.err (!%p5076_p9)
}
  0x19   :  { %s5107_s16 = smov [#allocation4]  }
  0x1a   :  { %35 = dma.vmem_to_smem %s33_s15, 16, %s5107_s16, [#allocation6]  }
  0x1b   :  { %5102 = dma.done.wait [#allocation6], 16  }
  0x1c   :  { %5103 = vsyncadd [#allocation6], 4294967280 }
  0x1d   :  { %61 = sfence }
  0x1e   :  { %v64_v0 = vld [vmem:[%s6063_s2] sm:$0xff]  ;;  %vm91_vm0 = vcmask 261120   ;;  %v65_v1 = vld [vmem:[%s6063_s2 + $0x8] sm:$0xff]  ;;  %v5214_v15 = vld [vmem:[%s6065_s4 + $0x18] sm:$0xff]   ;;  %v5108_v16 = vmov 0.0   ;;  %vm5109_vm1 = vmmov 0  }
  0x1f   :  { %v92_v2 = vsel %vm91_vm0, %v64_v0, 0.0  ;;  %v95_v3 = vsel %vm91_vm0, %v65_v1, 0.0  ;;  %v5209_v14 = vld [vmem:[%s6065_s4 + $0x8] sm:$0xff]   ;;  %4426 = vmatprep.subr.bf16.mxu0 %v5108_v16  ;;  %4434 = vmatprep.subr.bf16.mxu1 %v5108_v16  ;;  %v5223_v17 = vld [vmem:[%s6065_s4] sm:$0xff]   ;;  %v5228_v18 = vld [vmem:[%s6065_s4 + $0x10] sm:$0xff]   ;;  %s70_s28 = sld [smem:[#allocation4]] }
  0x20   :  { %93 = vadd.xlane.f32.xlu0 %v92_v2  ;;  %4427 = vmatpush3.bf16.msra.mxu0 %v5209_v14  ;;  %s5240_s29 = sld [smem:[#allocation4 + $0x1]]  ;;  %v4940_v41 = vld [vmem:[%s6065_s4 + $0x28] sm:$0xff]   ;;  %v4941_v42 = vld [vmem:[%s6065_s4 + $0x38] sm:$0xff]   ;;  %v4942_v45 = vld [vmem:[%s6065_s4 + $0x20] sm:$0xff]   ;;  %vm542_vm6 = vcmask 64512   ;;  %s5112_s1 = smov 112  }
  0x21   :  { %4435 = vmatpush3.bf16.msra.mxu1 %v5214_v15  ;;  %4428 = vmatprep.subr.bf16.mxu0 %v5108_v16  ;;  %v4943_v46 = vld [vmem:[%s6065_s4 + $0x30] sm:$0xff]   ;;  %s5110_s4 = smov 120   ;;  %vm1049_vm8 = vcmask 1043456   ;;  %s5623_s20 = sld [smem:[#allocation4 + $0x3]]  ;;  %vm3059_vm14 = vcmask 130048  }
  0x22   :  { %4436 = vmatprep.subr.bf16.mxu1 %v5108_v16  ;;  %4430 = vmatprep.mubr.msk.bf16.mxu0 %vm5109_vm1, %v5108_v16  ;;  %s4142_s21 = sld [smem:[#allocation4 + $0x5]] }
  0x23   :  { %4438 = vmatprep.mubr.msk.bf16.mxu1 %vm5109_vm1, %v5108_v16 }
  0x24   :  { %96 = vadd.xlane.f32.xlu0 %v95_v3  ;;  %4429 = vmatpush3.bf16.msra.mxu0 %v5223_v17 }
  0x25   :  { %4437 = vmatpush3.bf16.msra.mxu1 %v5228_v18  ;;  %4442 = vmatprep.subr.bf16.mxu0 %v5108_v16  ;;  %v133_v36 = vstv %s70_s28  ;;  %s4143_s28 = sld [smem:[#allocation3 + $0x1]] }
  0x26   :  { %4450 = vmatprep.subr.bf16.mxu1 %v5108_v16  ;;  %v136_v38 = vstv %s5240_s29 }
  0xa9   :  { %v94_v4 = vpop.xlane.xlu0 %93 }
  0xaa   :  { %v99_v5 = vmul.f32 0.03125, %v94_v4 }
  0xac   :  { %v101_v6 = vsub.f32 %v64_v0, %v99_v5 }
  0xad   :  { %v97_v7 = vpop.xlane.xlu0 %96 }
  0xae   :  { %v100_v8 = vmul.f32 0.03125, %v97_v7  ;;  %v103_v9 = vmul.f32 %v101_v6, %v101_v6 }
  0xb0   :  { %v5200_v10 = vsub.f32 %v65_v1, %v100_v8  ;;  %v105_v11 = vsel %vm91_vm0, %v103_v9, 0.0 }
  0xb1   :  { %106 = vadd.xlane.f32.xlu1 %v105_v11 }
  0xb2   :  { %v104_v12 = vmul.f32 %v5200_v10, %v5200_v10 }
  0xb4   :  { %v108_v13 = vsel %vm91_vm0, %v104_v12, 0.0 }
  0xb5   :  { %109 = vadd.xlane.f32.xlu1 %v108_v13 }
 0x13a   :  { %v107_v19 = vpop.xlane.xlu1 %106 }
 0x13b   :  { %v111_v20 = vmul.f32 0.032258064, %v107_v19 }
 0x13d   :  { %4966 = vrsqrt.f32 %v111_v20  ;;  %vm115_vm2 = vcmp.eq.f32.partialorder %v111_v20, inf  ;;  %v118_v25 = vand.u32 2147483648, %v111_v20  ;;  %vm117_vm3 = vcmp.eq.f32.partialorder %v111_v20, 0.0 }
 0x13e   :  { %v110_v21 = vpop.xlane.xlu1 %109 }
 0x13f   :  { %v112_v22 = vmul.f32 0.032258064, %v110_v21 }
 0x141   :  { %4968 = vrsqrt.f32 %v112_v22  ;;  %vm122_vm4 = vcmp.eq.f32.partialorder %v112_v22, inf  ;;  %v125_v29 = vand.u32 2147483648, %v112_v22  ;;  %vm124_vm5 = vcmp.eq.f32.partialorder %v112_v22, 0.0 }
 0x14a   :  { %v4967_v23 = vpop.eup %4966 }
 0x14b   :  { %v114_v24 = vmul.f32 %v4967_v23, %v111_v20 }
 0x14d   :  { %v116_v26 = vsel %vm115_vm2, %v111_v20, %v114_v24 }
 0x14e   :  { %v4969_v27 = vpop.eup %4968  ;;  %v119_v28 = vsel %vm117_vm3, %v118_v25, %v116_v26 }
 0x14f   :  { %v127_v30 = vadd.f32 1e-06, %v119_v28  ;;  %v121_v31 = vmul.f32 %v4969_v27, %v112_v22 }
 0x151   :  { %4970 = vrcp.f32 %v127_v30  ;;  %v123_v32 = vsel %vm122_vm4, %v112_v22, %v121_v31 }
 0x152   :  { %v126_v33 = vsel %vm124_vm5, %v125_v29, %v123_v32  ;;  %vm4072_vm5 = vcmask 523264  }
 0x153   :  { %v128_v34 = vadd.f32 1e-06, %v126_v33 }
 0x155   :  { %4972 = vrcp.f32 %v128_v34 }
 0x15e   :  { %v4971_v35 = vpop.eup %4970 }
 0x15f   :  { %v130_v37 = vmul.f32 %v4971_v35, %v101_v6 }
 0x161   :  { %v134_v39 = vmul.f32 %v133_v36, %v130_v37 }
 0x162   :  { %v4973_v44 = vpop.eup %4972 }
 0x163   :  { %v137_v40 = vadd.f32 %v136_v38, %v134_v39  ;;  %v132_v47 = vmul.f32 %v4973_v44, %v5200_v10  ;;  %v76_v44 = vlaneseq }
 0x165   :  { %v155_v43 = vpack.c.bf16 %v137_v40, %v137_v40  ;;  %v135_v48 = vmul.f32 %v133_v36, %v132_v47 }
 0x167   :  { %4431 = vmatmul.mubr.msk.bf16.vlgmr.msra.gmra.mxu0 %vm91_vm0, %v155_v43  ;;  %4439 = vmatmul.mubr.msk.bf16.vlgmr.msra.gmra.mxu1 %vm91_vm0, %v155_v43  ;;  %v138_v49 = vadd.f32 %v136_v38, %v135_v48 }
 0x168   :  { %4443 = vmatpush3.bf16.msra.mxu0 %v4940_v41  ;;  %4451 = vmatpush3.bf16.msra.mxu1 %v4941_v42 }
 0x169   :  { %4444 = vmatprep.subr.bf16.mxu0 %v5108_v16  ;;  %4452 = vmatprep.subr.bf16.mxu1 %v5108_v16  ;;  %v156_v50 = vpack.c.bf16 %v138_v49, %v138_v49  ;;  %v5111_v49 = vmov -1e+09  }
 0x16a   :  { %4446 = vmatprep.mubr.msk.bf16.mxu0 %vm5109_vm1, %v5108_v16  ;;  %4454 = vmatprep.mubr.msk.bf16.mxu1 %vm5109_vm1, %v5108_v16 }
 0x16c   :  { %4445 = vmatpush3.bf16.msra.mxu0 %v4942_v45  ;;  %4453 = vmatpush3.bf16.msra.mxu1 %v4943_v46 }
 0x16d   :  { %4458 = vmatprep.subr.bf16.mxu0 %v5108_v16  ;;  %4466 = vmatprep.subr.bf16.mxu1 %v5108_v16 }
 0x16f   :  { %4447 = vmatmul.mubr.msk.bf16.vlgmr.msra.gmra.mxu0 %vm91_vm0, %v155_v43  ;;  %4455 = vmatmul.mubr.msk.bf16.vlgmr.msra.gmra.mxu1 %vm91_vm0, %v155_v43 }
 0x170   :  { %4459 = vmatpush3.bf16.msra.mxu0 %v5209_v14  ;;  %4467 = vmatpush3.bf16.msra.mxu1 %v5214_v15 }
 0x171   :  { %4460 = vmatprep.subr.bf16.mxu0 %v5108_v16  ;;  %4468 = vmatprep.subr.bf16.mxu1 %v5108_v16 }
 0x172   :  { %4462 = vmatprep.mubr.msk.bf16.mxu0 %vm5109_vm1, %v5108_v16  ;;  %4470 = vmatprep.mubr.msk.bf16.mxu1 %vm5109_vm1, %v5108_v16 }
 0x174   :  { %4461 = vmatpush3.bf16.msra.mxu0 %v5223_v17  ;;  %4469 = vmatpush3.bf16.msra.mxu1 %v5228_v18 }
 0x175   :  { %4474 = vmatprep.subr.bf16.mxu0 %v5108_v16  ;;  %4482 = vmatprep.subr.bf16.mxu1 %v5108_v16 }
 0x177   :  { %4463 = vmatmul.mubr.msk.bf16.vlgmr.msra.gmra.mxu0 %vm91_vm0, %v156_v50  ;;  %4471 = vmatmul.mubr.msk.bf16.vlgmr.msra.gmra.mxu1 %vm91_vm0, %v156_v50 }
 0x178   :  { %4475 = vmatpush3.bf16.msra.mxu0 %v4940_v41  ;;  %4483 = vmatpush3.bf16.msra.mxu1 %v4941_v42 }
 0x179   :  { %4476 = vmatprep.subr.bf16.mxu0 %v5108_v16  ;;  %4484 = vmatprep.subr.bf16.mxu1 %v5108_v16 }
 0x17a   :  { %4478 = vmatprep.mubr.msk.bf16.mxu0 %vm5109_vm1, %v5108_v16  ;;  %4486 = vmatprep.mubr.msk.bf16.mxu1 %vm5109_vm1, %v5108_v16 }
 0x17c   :  { %4477 = vmatpush3.bf16.msra.mxu0 %v4942_v45  ;;  %4485 = vmatpush3.bf16.msra.mxu1 %v4943_v46  ;;  %v5376_v45 = vshrl.u32 %v76_v44, 7  ;;  %v5378_v46 = vand.u32 127, %v76_v44 }
 0x17d   :  { %4490 = vmatprep.subr.bf16.mxu0 %v5108_v16  ;;  %4496 = vmatprep.subr.bf16.mxu1 %v5108_v16 }
 0x17e   :  { %vm80_vm7 = vcmp.le.s32.totalorder %v5378_v46, %v5376_v45 }
 0x17f   :  { %4479 = vmatmul.mubr.msk.bf16.vlgmr.msra.gmra.mxu0 %vm91_vm0, %v156_v50  ;;  %4487 = vmatmul.mubr.msk.bf16.vlgmr.msra.gmra.mxu1 %vm91_vm0, %v156_v50  ;;  %v5383_v50 = vsel %vm80_vm7, 0.0, %v5111_v49 }
 0x180   :  { %4492 = vmatprep.mubr.msk.bf16.mxu0 %vm5109_vm1, %v5108_v16  ;;  %4498 = vmatprep.mubr.msk.bf16.mxu1 %vm5109_vm1, %v5108_v16 }
 0x227   :  { %v206_v51 = vpop.f32.mrf.mxu0  ;;  %v258_v52 = vpop.f32.mrf.mxu1 }
 0x228   :  { %v5296_v53 = vpack.c.bf16 %v206_v51, %v206_v51  ;;  %v5298_v54 = vpack.c.bf16 %v258_v52, %v258_v52 }
 0x229   :  { %v4432_v55 = vpop.f32.mrf.mxu0  ;;  %v4440_v56 = vpop.f32.mrf.mxu1 }
 0x22a   :  { %540 = vrot.lane.b32.xlu0 %v5296_v53, %s5110_s4  ;;  %590 = vrot.lane.b32.xlu1 %v5298_v54, %s5110_s4 }
 0x22b   :  { %v209_v57 = vpop.f32.mrf.mxu0  ;;  %v261_v58 = vpop.f32.mrf.mxu1 }
 0x22d   :  { %v4433_v59 = vpop.f32.mrf.mxu0  ;;  %v4441_v60 = vpop.f32.mrf.mxu1 }
 0x22f   :  { %v310_v61 = vpop.f32.mrf.mxu0  ;;  %v362_v62 = vpop.f32.mrf.mxu1 }
 0x230   :  { %v5304_v63 = vpack.c.bf16 %v310_v61, %v310_v61  ;;  %v5308_v4 = vpack.c.bf16 %v362_v62, %v362_v62 }
 0x231   :  { %v4448_v0 = vpop.f32.mrf.mxu0  ;;  %v4456_v1 = vpop.f32.mrf.mxu1 }
 0x232   :  { %639 = vrot.lane.b32.xlu1 %v5304_v63, %s5110_s4 }
 0x233   :  { %v313_v2 = vpop.f32.mrf.mxu0  ;;  %v365_v3 = vpop.f32.mrf.mxu1 }
 0x235   :  { %v4449_v5 = vpop.f32.mrf.mxu0  ;;  %v4457_v6 = vpop.f32.mrf.mxu1 }
 0x236   :  { %688 = vrot.lane.b32.xlu1 %v5308_v4, %s5110_s4 }
 0x237   :  { %v405_v7 = vpop.f32.mrf.mxu0  ;;  %v445_v8 = vpop.f32.mrf.mxu1 }
 0x238   :  { %v5312_v9 = vpack.c.bf16 %v405_v7, %v405_v7  ;;  %v5314_v10 = vpack.c.bf16 %v445_v8, %v445_v8 }
 0x239   :  { %v4464_v11 = vpop.f32.mrf.mxu0  ;;  %v4472_v12 = vpop.f32.mrf.mxu1 }
 0x23a   :  { %786 = vrot.lane.b32.xlu1 %v5314_v10, %s5110_s4  ;;  %737 = vrot.lane.b32.xlu0 %v5312_v9, %s5110_s4 }
 0x23b   :  { %v408_v13 = vpop.f32.mrf.mxu0  ;;  %v448_v14 = vpop.f32.mrf.mxu1 }
 0x23d   :  { %v4465_v15 = vpop.f32.mrf.mxu0  ;;  %v4473_v17 = vpop.f32.mrf.mxu1 }
 0x23f   :  { %v485_v18 = vpop.f32.mrf.mxu0  ;;  %v525_v19 = vpop.f32.mrf.mxu1 }
 0x240   :  { %v5320_v20 = vpack.c.bf16 %v485_v18, %v485_v18  ;;  %v5322_v21 = vpack.c.bf16 %v525_v19, %v525_v19 }
 0x241   :  { %v4480_v22 = vpop.f32.mrf.mxu0  ;;  %v4488_v23 = vpop.f32.mrf.mxu1 }
 0x242   :  { %884 = vrot.lane.b32.xlu1 %v5322_v21, %s5110_s4  ;;  %835 = vrot.lane.b32.xlu0 %v5320_v20, %s5110_s4 }
 0x243   :  { %v488_v24 = vpop.f32.mrf.mxu0  ;;  %v528_v25 = vpop.f32.mrf.mxu1 }
 0x245   :  { %v4481_v26 = vpop.f32.mrf.mxu0  ;;  %v4489_v27 = vpop.f32.mrf.mxu1 }
 0x29c   :  { %v591_v28 = vpop.permute.xlu1 %590  ;;  %v541_v29 = vpop.permute.xlu0 %540 }
 0x29d   :  { %v596_v30 = vsel %vm542_vm6, %v591_v28, 0  ;;  %v547_v31 = vsel %vm542_vm6, %v541_v29, 0 }
 0x29e   :  { %4491 = vmatpush3.bf16.xpose.msra.mxu0 %v547_v31  ;;  %4497 = vmatpush3.bf16.xpose.msra.mxu1 %v596_v30 }
 0x29f   :  { %4502 = vmatprep.subr.bf16.mxu0 %v5108_v16  ;;  %4508 = vmatprep.subr.bf16.mxu1 %v5108_v16 }
 0x2a4   :  { %v640_v32 = vpop.permute.xlu1 %639 }
 0x2a5   :  { %v645_v33 = vsel %vm542_vm6, %v640_v32, 0  ;;  %4493 = vmatmul.mubr.msk.bf16.vlgmr.msra.gmra.mxu0 %vm542_vm6, %v5296_v53  ;;  %4499 = vmatmul.mubr.msk.bf16.vlgmr.msra.gmra.mxu1 %vm542_vm6, %v5298_v54 }
 0x2a6   :  { %4503 = vmatpush3.bf16.xpose.msra.mxu0 %v645_v33  ;;  %4504 = vmatprep.mubr.msk.bf16.mxu0 %vm5109_vm1, %v5108_v16 }
 0x2a7   :  { %4514 = vmatprep.subr.bf16.mxu0 %v5108_v16  ;;  %4510 = vmatprep.mubr.msk.bf16.mxu1 %vm5109_vm1, %v5108_v16 }
 0x2a8   :  { %v689_v34 = vpop.permute.xlu1 %688 }
 0x2a9   :  { %v694_v35 = vsel %vm542_vm6, %v689_v34, 0 }
 0x2aa   :  { %4509 = vmatpush3.bf16.xpose.msra.mxu1 %v694_v35 }
 0x2ab   :  { %4520 = vmatprep.subr.bf16.mxu1 %v5108_v16 }
 0x2ac   :  { %v738_v36 = vpop.permute.xlu0 %737  ;;  %v787_v38 = vpop.permute.xlu1 %786 }
 0x2ad   :  { %v743_v37 = vsel %vm542_vm6, %v738_v36, 0  ;;  %4505 = vmatmul.mubr.msk.bf16.vlgmr.msra.gmra.mxu0 %vm542_vm6, %v5304_v63  ;;  %v792_v39 = vsel %vm542_vm6, %v787_v38, 0 }
 0x2ae   :  { %4515 = vmatpush3.bf16.xpose.msra.mxu0 %v743_v37  ;;  %4516 = vmatprep.mubr.msk.bf16.mxu0 %vm5109_vm1, %v5108_v16 }
 0x2af   :  { %4526 = vmatprep.subr.bf16.mxu0 %v5108_v16 }
 0x2b1   :  { %4511 = vmatmul.mubr.msk.bf16.vlgmr.msra.gmra.mxu1 %vm542_vm6, %v5308_v4 }
 0x2b2   :  { %4521 = vmatpush3.bf16.xpose.msra.mxu1 %v792_v39  ;;  %4522 = vmatprep.mubr.msk.bf16.mxu1 %vm5109_vm1, %v5108_v16 }
 0x2b3   :  { %4532 = vmatprep.subr.bf16.mxu1 %v5108_v16 }
 0x2b4   :  { %v836_v40 = vpop.permute.xlu0 %835  ;;  %v885_v42 = vpop.permute.xlu1 %884 }
 0x2b5   :  { %v841_v41 = vsel %vm542_vm6, %v836_v40, 0  ;;  %4517 = vmatmul.mubr.msk.bf16.vlgmr.msra.gmra.mxu0 %vm542_vm6, %v5312_v9  ;;  %v890_v43 = vsel %vm542_vm6, %v885_v42, 0 }
 0x2b6   :  { %4527 = vmatpush3.bf16.xpose.msra.mxu0 %v841_v41  ;;  %4528 = vmatprep.mubr.msk.bf16.mxu0 %vm5109_vm1, %v5108_v16 }
 0x2b7   :  { %4538 = vmatprep.subr.bf16.mxu0 %v5108_v16 }
 0x2b9   :  { %4523 = vmatmul.mubr.msk.bf16.vlgmr.msra.gmra.mxu1 %vm542_vm6, %v5314_v10 }
 0x2ba   :  { %4533 = vmatpush3.bf16.xpose.msra.mxu1 %v890_v43  ;;  %4534 = vmatprep.mubr.msk.bf16.mxu1 %vm5109_vm1, %v5108_v16 }
 0x2bb   :  { %4544 = vmatprep.subr.bf16.mxu1 %v5108_v16 }
 0x2bd   :  { %4529 = vmatmul.mubr.msk.bf16.vlgmr.msra.gmra.mxu0 %vm542_vm6, %v5320_v20 }
 0x2be   :  { %4540 = vmatprep.mubr.msk.bf16.mxu0 %vm5109_vm1, %v5108_v16 }
 0x2c1   :  { %4535 = vmatmul.mubr.msk.bf16.vlgmr.msra.gmra.mxu1 %vm542_vm6, %v5322_v21 }
 0x2c2   :  { %4546 = vmatprep.mubr.msk.bf16.mxu1 %vm5109_vm1, %v5108_v16 }
 0x365   :  { %v583_v47 = vpop.f32.mrf.mxu0  ;;  %v632_v48 = vpop.f32.mrf.mxu1 }
 0x366   :  { %v932_v51 = vmul.f32 0.35355338, %v583_v47  ;;  %v933_v52 = vmul.f32 0.35355338, %v632_v48 }
 0x367   :  { %v4494_v55 = vpop.f32.mrf.mxu0  ;;  %v4500_v56 = vpop.f32.mrf.mxu1 }
 0x368   :  { %v5386_v57 = vadd.f32 %v933_v52, %v5383_v50  ;;  %v5389_v58 = vadd.f32 %v932_v51, %v5383_v50 }
 0x369   :  { %v586_v59 = vpop.f32.mrf.mxu0  ;;  %v635_v60 = vpop.f32.mrf.mxu1 }
 0x36a   :  { %v951_v61 = vsel %vm542_vm6, %v5386_v57, -inf  ;;  %v948_v62 = vsel %vm542_vm6, %v5389_v58, -inf }
 0x36b   :  { %952 = vmax.xlane.f32.xlu1 %v951_v61  ;;  %v4501_v0 = vpop.f32.mrf.mxu1  ;;  %949 = vmax.xlane.f32.xlu0 %v948_v62  ;;  %v4495_v1 = vpop.f32.mrf.mxu0 }
 0x36d   :  { %v681_v2 = vpop.f32.mrf.mxu0 }
 0x36e   :  { %v934_v3 = vmul.f32 0.35355338, %v681_v2 }
 0x36f   :  { %v4506_v5 = vpop.f32.mrf.mxu0 }
 0x370   :  { %v942_v6 = vadd.f32 %v934_v3, %v5383_v50 }
 0x371   :  { %v684_v7 = vpop.f32.mrf.mxu0  ;;  %v730_v8 = vpop.f32.mrf.mxu1 }
 0x372   :  { %v935_v11 = vmul.f32 0.35355338, %v730_v8  ;;  %v954_v12 = vsel %vm542_vm6, %v942_v6, -inf }
 0x373   :  { %v4512_v13 = vpop.f32.mrf.mxu1  ;;  %955 = vmax.xlane.f32.xlu0 %v954_v12  ;;  %v4507_v14 = vpop.f32.mrf.mxu0 }
 0x374   :  { %v5398_v15 = vadd.f32 %v935_v11, %v5383_v50 }
 0x375   :  { %v733_v17 = vpop.f32.mrf.mxu1  ;;  %v779_v18 = vpop.f32.mrf.mxu0 }
 0x376   :  { %v936_v19 = vmul.f32 0.35355338, %v779_v18  ;;  %v957_v22 = vsel %vm542_vm6, %v5398_v15, -inf }
 0x377   :  { %v4513_v23 = vpop.f32.mrf.mxu1  ;;  %958 = vmax.xlane.f32.xlu0 %v957_v22  ;;  %v4518_v24 = vpop.f32.mrf.mxu0 }
 0x378   :  { %v5403_v25 = vadd.f32 %v936_v19, %v5383_v50 }
 0x379   :  { %v782_v26 = vpop.f32.mrf.mxu0  ;;  %v828_v27 = vpop.f32.mrf.mxu1 }
 0x37a   :  { %v937_v28 = vmul.f32 0.35355338, %v828_v27  ;;  %v960_v29 = vsel %vm542_vm6, %v5403_v25, -inf }
 0x37b   :  { %v4524_v30 = vpop.f32.mrf.mxu1  ;;  %961 = vmax.xlane.f32.xlu0 %v960_v29  ;;  %v4519_v31 = vpop.f32.mrf.mxu0 }
 0x37c   :  { %v5408_v32 = vadd.f32 %v937_v28, %v5383_v50 }
 0x37d   :  { %v831_v33 = vpop.f32.mrf.mxu1  ;;  %v877_v34 = vpop.f32.mrf.mxu0 }
 0x37e   :  { %v938_v35 = vmul.f32 0.35355338, %v877_v34  ;;  %v963_v36 = vsel %vm542_vm6, %v5408_v32, -inf }
 0x37f   :  { %964 = vmax.xlane.f32.xlu1 %v963_v36  ;;  %v4525_v37 = vpop.f32.mrf.mxu1  ;;  %v4530_v38 = vpop.f32.mrf.mxu0 }
 0x380   :  { %v5413_v39 = vadd.f32 %v938_v35, %v5383_v50 }
 0x381   :  { %v880_v40 = vpop.f32.mrf.mxu0  ;;  %v926_v41 = vpop.f32.mrf.mxu1 }
 0x382   :  { %v966_v42 = vsel %vm542_vm6, %v5413_v39, -inf  ;;  %v939_v51 = vmul.f32 0.35355338, %v926_v41 }
 0x383   :  { %v4536_v43 = vpop.f32.mrf.mxu1  ;;  %967 = vmax.xlane.f32.xlu0 %v966_v42  ;;  %v4531_v44 = vpop.f32.mrf.mxu0 }
 0x384   :  { %v947_v52 = vadd.f32 %v939_v51, %v5383_v50 }
 0x385   :  { %v929_v47 = vpop.f32.mrf.mxu1 }
 0x386   :  { %v969_v55 = vsel %vm542_vm6, %v947_v52, -inf }
 0x387   :  { %v4537_v48 = vpop.f32.mrf.mxu1 }
 0x390   :  { %1093 = vrot.lane.b32.xlu1 %v5298_v54, %s5112_s1 }
 0x394   :  { %1141 = vrot.lane.b32.xlu1 %v5304_v63, %s5112_s1 }
 0x399   :  { %1044 = vrot.lane.b32.xlu0 %v5296_v53, %s5112_s1 }
 0x3b8   :  { %970 = vmax.xlane.f32.xlu1 %v969_v55 }
 0x3c9   :  { %1189 = vrot.lane.b32.xlu1 %v5308_v4, %s5112_s1 }
 0x3f4   :  { %v953_v56 = vpop.xlane.xlu1 %952  ;;  %v950_v59 = vpop.xlane.xlu0 %949 }
 0x3f5   :  { %v973_v60 = vsub.f32 %v5386_v57, %v953_v56  ;;  %v972_v54 = vsub.f32 %v5389_v58, %v950_v59 }
 0x3f7   :  { %v982_v61 = vmul.f32 1.442695, %v973_v60  ;;  %v980_v63 = vmul.f32 1.442695, %v972_v54 }
 0x3f9   :  { %4974 = vpow2.f32 %v982_v61 }
 0x3fa   :  { %4976 = vpow2.f32 %v980_v63 }
 0x3fc   :  { %v956_v53 = vpop.xlane.xlu0 %955 }
 0x3fd   :  { %v974_v62 = vsub.f32 %v942_v6, %v956_v53 }
 0x3ff   :  { %v984_v0 = vmul.f32 1.442695, %v974_v62 }
 0x400   :  { %v959_v50 = vpop.xlane.xlu0 %958 }
 0x401   :  { %4978 = vpow2.f32 %v984_v0  ;;  %v975_v14 = vsub.f32 %v5398_v15, %v959_v50 }
 0x403   :  { %v986_v17 = vmul.f32 1.442695, %v975_v14 }
 0x404   :  { %v962_v3 = vpop.xlane.xlu0 %961 }
 0x405   :  { %4980 = vpow2.f32 %v986_v17  ;;  %v976_v19 = vsub.f32 %v5403_v25, %v962_v3  ;;  %v1429_v17 = vld [vmem:[%s6066_s5] sm:$0xf] }
 0x406   :  { %v5429_v1 = vpop.eup %4974 }
 0x407   :  { %v5431_v2 = vpop.eup %4976  ;;  %v999_v4 = vsel %vm542_vm6, %v5429_v1, 0.0  ;;  %v988_v23 = vmul.f32 1.442695, %v976_v19  ;;  %v1445_v19 = vsel %vm1049_vm8, %v1429_v17, 0 }
 0x408   :  { %1000 = vadd.xlane.f32.xlu1 %v999_v4  ;;  %v965_v57 = vpop.xlane.xlu1 %964  ;;  %v996_v58 = vsel %vm542_vm6, %v5431_v2, 0.0 }
 0x409   :  { %997 = vadd.xlane.f32.xlu0 %v996_v58  ;;  %v977_v18 = vsub.f32 %v5408_v32, %v965_v57 }
 0x40b   :  { %v990_v22 = vmul.f32 1.442695, %v977_v18 }
 0x40c   :  { %v1094_v5 = vpop.permute.xlu1 %1093  ;;  %v968_v6 = vpop.xlane.xlu0 %967 }
 0x40d   :  { %v1099_v7 = vsel %vm1049_vm8, %v1094_v5, 0  ;;  %4982 = vpow2.f32 %v990_v22  ;;  %v978_v24 = vsub.f32 %v5413_v39, %v968_v6 }
 0x40e   :  { %v5438_v8 = vpop.eup %4978  ;;  %4545 = vmatpush3.bf16.msra.mxu1 %v1099_v7  ;;  %4984 = vpow2.f32 %v988_v23  ;;  %v1430_v23 = vld [vmem:[%s6066_s5 + $0x4] sm:$0xf] }
 0x40f   :  { %v1002_v11 = vsel %vm542_vm6, %v5438_v8, 0.0  ;;  %4556 = vmatprep.subr.bf16.mxu1 %v5108_v16  ;;  %v992_v26 = vmul.f32 1.442695, %v978_v24 }
 0x410   :  { %1003 = vadd.xlane.f32.xlu0 %v1002_v11  ;;  %v1045_v12 = vpop.permute.xlu0 %1044  ;;  %v1142_v27 = vpop.permute.xlu1 %1141 }
 0x411   :  { %v1051_v13 = vsel %vm1049_vm8, %v1045_v12, 0  ;;  %4986 = vpow2.f32 %v992_v26 }
 0x412   :  { %4539 = vmatpush3.bf16.msra.mxu0 %v1051_v13 }
 0x413   :  { %4550 = vmatprep.subr.bf16.mxu0 %v5108_v16 }
 0x419   :  { %1285 = vrot.lane.b32.xlu1 %v5314_v10, %s5112_s1  ;;  %v5453_v10 = vpop.eup %4980 }
 0x41a   :  { %v1005_v15 = vsel %vm542_vm6, %v5453_v10, 0.0 }
 0x426   :  { %1237 = vrot.lane.b32.xlu0 %v5312_v9, %s5112_s1  ;;  %v5457_v9 = vpop.eup %4982 }
 0x427   :  { %v1011_v25 = vsel %vm542_vm6, %v5457_v9, 0.0  ;;  %v5461_v28 = vpop.eup %4984 }
 0x428   :  { %v1008_v32 = vsel %vm542_vm6, %v5461_v28, 0.0  ;;  %v5465_v33 = vpop.eup %4986 }
 0x429   :  { %v1014_v34 = vsel %vm542_vm6, %v5465_v33, 0.0 }
 0x43d   :  { %1006 = vadd.xlane.f32.xlu1 %v1005_v15  ;;  %v1432_v15 = vld [vmem:[%s6066_s5 + $0xc] sm:$0xf] }
 0x441   :  { %v971_v29 = vpop.xlane.xlu1 %970  ;;  %1012 = vadd.xlane.f32.xlu1 %v1011_v25 }
 0x442   :  { %v979_v30 = vsub.f32 %v947_v52, %v971_v29  ;;  %v1583_v29 = vsel %vm1049_vm8, %v1432_v15, 0 }
 0x444   :  { %v994_v31 = vmul.f32 1.442695, %v979_v30 }
 0x445   :  { %1009 = vadd.xlane.f32.xlu0 %v1008_v32  ;;  %v1190_v37 = vpop.permute.xlu1 %1189 }
 0x446   :  { %4988 = vpow2.f32 %v994_v31 }
 0x449   :  { %1015 = vadd.xlane.f32.xlu0 %v1014_v34 }
 0x453   :  { %v5469_v35 = vpop.eup %4988 }
 0x454   :  { %v1017_v36 = vsel %vm542_vm6, %v5469_v35, 0.0 }
 0x455   :  { %1018 = vadd.xlane.f32.xlu1 %v1017_v36 }
 0x45f   :  { %1333 = vrot.lane.b32.xlu0 %v5320_v20, %s5112_s1  ;;  %v1195_v20 = vsel %vm1049_vm8, %v1190_v37, 0 }
 0x466   :  { %1381 = vrot.lane.b32.xlu1 %v5322_v21, %s5112_s1  ;;  %v1147_v21 = vsel %vm1049_vm8, %v1142_v27, 0  ;;  %s5621_s1 = sld [smem:[#allocation4 + $0x2]] }
 0x491   :  { %v1001_v38 = vpop.xlane.xlu1 %1000 }
 0x492   :  { %4990 = vrcp.f32 %v1001_v38  ;;  %v998_v39 = vpop.xlane.xlu0 %997 }
 0x493   :  { %4992 = vrcp.f32 %v998_v39 }
 0x495   :  { %v1286_v60 = vpop.permute.xlu1 %1285 }
 0x499   :  { %v1004_v40 = vpop.xlane.xlu0 %1003 }
 0x49a   :  { %4994 = vrcp.f32 %v1004_v40 }
 0x49d   :  { %v1238_v55 = vpop.permute.xlu0 %1237 }
 0x49e   :  { %v1243_v59 = vsel %vm1049_vm8, %v1238_v55, 0 }
 0x49f   :  { %v4991_v41 = vpop.eup %4990 }
 0x4a0   :  { %v4993_v42 = vpop.eup %4992  ;;  %v1029_v43 = vmul.f32 %v4991_v41, %v5429_v1 }
 0x4a1   :  { %v1028_v44 = vmul.f32 %v4993_v42, %v5431_v2  ;;  %v1291_v2 = vsel %vm1049_vm8, %v1286_v60, 0 }
 0x4a2   :  { %v1037_v47 = vpack.c.bf16 %v1029_v43, %v1029_v43 }
 0x4a3   :  { %v1036_v48 = vpack.c.bf16 %v1028_v44, %v1028_v44 }
 0x4a4   :  { %4547 = vmatmul.mubr.msk.bf16.vlgmr.msra.gmra.mxu1 %vm542_vm6, %v1037_v47 }
 0x4a5   :  { %4541 = vmatmul.mubr.msk.bf16.vlgmr.msra.gmra.mxu0 %vm542_vm6, %v1036_v48  ;;  %4557 = vmatpush3.bf16.msra.mxu1 %v1195_v20 }
 0x4a6   :  { %4551 = vmatpush3.bf16.msra.mxu0 %v1147_v21  ;;  %4552 = vmatprep.mubr.msk.bf16.mxu0 %vm5109_vm1, %v5108_v16 }
 0x4a7   :  { %v4995_v51 = vpop.eup %4994  ;;  %4562 = vmatprep.subr.bf16.mxu0 %v5108_v16  ;;  %4558 = vmatprep.mubr.msk.bf16.mxu1 %vm5109_vm1, %v5108_v16 }
 0x4a8   :  { %v1030_v52 = vmul.f32 %v4995_v51, %v5438_v8  ;;  %4568 = vmatprep.subr.bf16.mxu1 %v5108_v16 }
 0x4aa   :  { %v1038_v56 = vpack.c.bf16 %v1030_v52, %v1030_v52 }
 0x4ad   :  { %4553 = vmatmul.mubr.msk.bf16.vlgmr.msra.gmra.mxu0 %vm542_vm6, %v1038_v56 }
 0x4ae   :  { %4563 = vmatpush3.bf16.msra.mxu0 %v1243_v59  ;;  %4564 = vmatprep.mubr.msk.bf16.mxu0 %vm5109_vm1, %v5108_v16 }
 0x4af   :  { %4574 = vmatprep.subr.bf16.mxu0 %v5108_v16 }
 0x4c6   :  { %v1007_v54 = vpop.xlane.xlu1 %1006 }
 0x4c7   :  { %4996 = vrcp.f32 %v1007_v54 }
 0x4ca   :  { %v1013_v61 = vpop.xlane.xlu1 %1012 }
 0x4cb   :  { %4998 = vrcp.f32 %v1013_v61 }
 0x4ce   :  { %v1010_v63 = vpop.xlane.xlu0 %1009 }
 0x4cf   :  { %5000 = vrcp.f32 %v1010_v63 }
 0x4d2   :  { %v1016_v53 = vpop.xlane.xlu0 %1015 }
 0x4d3   :  { %5002 = vrcp.f32 %v1016_v53 }
 0x4d4   :  { %v4997_v62 = vpop.eup %4996 }
 0x4d5   :  { %v1031_v0 = vmul.f32 %v4997_v62, %v5453_v10  ;;  %v1491_v10 = vsel %vm1049_vm8, %v1430_v23, 0 }
 0x4d6   :  { %v1334_v58 = vpop.permute.xlu0 %1333 }
 0x4d7   :  { %v1039_v50 = vpack.c.bf16 %v1031_v0, %v1031_v0  ;;  %v1339_v11 = vsel %vm1049_vm8, %v1334_v58, 0 }
 0x4d8   :  { %v4999_v1 = vpop.eup %4998 }
 0x4d9   :  { %4559 = vmatmul.mubr.msk.bf16.vlgmr.msra.gmra.mxu1 %vm542_vm6, %v1039_v50  ;;  %v1033_v4 = vmul.f32 %v4999_v1, %v5457_v9  ;;  %v1431_v9 = vld [vmem:[%s6066_s5 + $0x8] sm:$0xf] }
 0x4da   :  { %4569 = vmatpush3.bf16.msra.mxu1 %v1291_v2  ;;  %4570 = vmatprep.mubr.msk.bf16.mxu1 %vm5109_vm1, %v5108_v16  ;;  %v1537_v32 = vsel %vm1049_vm8, %v1431_v9, 0 }
 0x4db   :  { %4580 = vmatprep.subr.bf16.mxu1 %v5108_v16  ;;  %v1041_v7 = vpack.c.bf16 %v1033_v4, %v1033_v4 }
 0x4dc   :  { %v5001_v3 = vpop.eup %5000 }
 0x4dd   :  { %v1032_v57 = vmul.f32 %v5001_v3, %v5461_v28 }
 0x4de   :  { %v1019_v5 = vpop.xlane.xlu1 %1018 }
 0x4df   :  { %5004 = vrcp.f32 %v1019_v5  ;;  %v1040_v6 = vpack.c.bf16 %v1032_v57, %v1032_v57 }
 0x4e0   :  { %v5003_v8 = vpop.eup %5002 }
 0x4e1   :  { %4565 = vmatmul.mubr.msk.bf16.vlgmr.msra.gmra.mxu0 %vm542_vm6, %v1040_v6  ;;  %4571 = vmatmul.mubr.msk.bf16.vlgmr.msra.gmra.mxu1 %vm542_vm6, %v1041_v7  ;;  %v1034_v14 = vmul.f32 %v5003_v8, %v5465_v33 }
 0x4e2   :  { %4575 = vmatpush3.bf16.msra.mxu0 %v1339_v11  ;;  %v1382_v12 = vpop.permute.xlu1 %1381  ;;  %4576 = vmatprep.mubr.msk.bf16.mxu0 %vm5109_vm1, %v5108_v16 }
 0x4e3   :  { %v1387_v13 = vsel %vm1049_vm8, %v1382_v12, 0  ;;  %4582 = vmatprep.mubr.msk.bf16.mxu1 %vm5109_vm1, %v5108_v16  ;;  %4586 = vmatprep.subr.bf16.mxu0 %v5108_v16  ;;  %v1042_v18 = vpack.c.bf16 %v1034_v14, %v1034_v14 }
 0x4e4   :  { %4581 = vmatpush3.bf16.msra.mxu1 %v1387_v13 }
 0x4e5   :  { %4592 = vmatprep.subr.bf16.mxu1 %v5108_v16 }
 0x4e9   :  { %4577 = vmatmul.mubr.msk.bf16.vlgmr.msra.gmra.mxu0 %vm542_vm6, %v1042_v18 }
 0x4ea   :  { %4587 = vmatpush3.bf16.msra.mxu0 %v1445_v19  ;;  %4588 = vmatprep.mubr.msk.bf16.mxu0 %vm5109_vm1, %v5108_v16 }
 0x4eb   :  { %4598 = vmatprep.subr.bf16.mxu0 %v5108_v16 }
 0x4ec   :  { %v5005_v22 = vpop.eup %5004 }
 0x4ed   :  { %v1035_v24 = vmul.f32 %v5005_v22, %v5469_v35 }
 0x4ef   :  { %v1043_v26 = vpack.c.bf16 %v1035_v24, %v1035_v24 }
 0x4f1   :  { %4583 = vmatmul.mubr.msk.bf16.vlgmr.msra.gmra.mxu1 %vm542_vm6, %v1043_v26 }
 0x4f2   :  { %4593 = vmatpush3.bf16.msra.mxu1 %v1491_v10  ;;  %4594 = vmatprep.mubr.msk.bf16.mxu1 %vm5109_vm1, %v5108_v16 }
 0x4f3   :  { %4604 = vmatprep.subr.bf16.mxu1 %v5108_v16 }
 0x564   :  { %v1135_v27 = vpop.f32.mrf.mxu1 }
 0x565   :  { %v1087_v25 = vpop.f32.mrf.mxu0  ;;  %v1434_v28 = vpack.c.bf16 %v1135_v27, %v1135_v27 }
 0x566   :  { %v1433_v30 = vpack.c.bf16 %v1087_v25, %v1087_v25  ;;  %v4548_v31 = vpop.f32.mrf.mxu1 }
 0x567   :  { %v4542_v33 = vpop.f32.mrf.mxu0  ;;  %4595 = vmatmul.mubr.msk.bf16.vlgmr.msra.gmra.mxu1 %vm542_vm6, %v1434_v28 }
 0x568   :  { %4589 = vmatmul.mubr.msk.bf16.vlgmr.msra.gmra.mxu0 %vm542_vm6, %v1433_v30  ;;  %v1138_v34 = vpop.f32.mrf.mxu1  ;;  %4605 = vmatpush3.bf16.msra.mxu1 %v1583_v29 }
 0x569   :  { %v1090_v35 = vpop.f32.mrf.mxu0  ;;  %4599 = vmatpush3.bf16.msra.mxu0 %v1537_v32  ;;  %4600 = vmatprep.mubr.msk.bf16.mxu0 %vm5109_vm1, %v5108_v16 }
 0x56a   :  { %v4549_v36 = vpop.f32.mrf.mxu1  ;;  %4606 = vmatprep.mubr.msk.bf16.mxu1 %vm5109_vm1, %v5108_v16  ;;  %4610 = vmatprep.subr.bf16.mxu0 %v5108_v16 }
 0x56b   :  { %v4543_v37 = vpop.f32.mrf.mxu0  ;;  %4616 = vmatprep.subr.bf16.mxu1 %v5108_v16 }
 0x56d   :  { %v1183_v38 = vpop.f32.mrf.mxu0 }
 0x56e   :  { %v1435_v39 = vpack.c.bf16 %v1183_v38, %v1183_v38 }
 0x56f   :  { %v4554_v40 = vpop.f32.mrf.mxu0 }
 0x570   :  { %4601 = vmatmul.mubr.msk.bf16.vlgmr.msra.gmra.mxu0 %vm542_vm6, %v1435_v39 }
 0x571   :  { %v1186_v41 = vpop.f32.mrf.mxu0  ;;  %4611 = vmatpush3.bf16.msra.mxu0 %v1445_v19  ;;  %4612 = vmatprep.mubr.msk.bf16.mxu0 %vm5109_vm1, %v5108_v16 }
 0x572   :  { %4622 = vmatprep.subr.bf16.mxu0 %v5108_v16 }
 0x573   :  { %v4555_v42 = vpop.f32.mrf.mxu0 }
 0x599   :  { %v1231_v43 = vpop.f32.mrf.mxu1 }
 0x59a   :  { %v1436_v44 = vpack.c.bf16 %v1231_v43, %v1231_v43 }
 0x59b   :  { %v4560_v47 = vpop.f32.mrf.mxu1 }
 0x59c   :  { %4607 = vmatmul.mubr.msk.bf16.vlgmr.msra.gmra.mxu1 %vm542_vm6, %v1436_v44 }
 0x59d   :  { %v1234_v48 = vpop.f32.mrf.mxu1  ;;  %4617 = vmatpush3.bf16.msra.mxu1 %v1491_v10  ;;  %4618 = vmatprep.mubr.msk.bf16.mxu1 %vm5109_vm1, %v5108_v16 }
 0x59e   :  { %4628 = vmatprep.subr.bf16.mxu1 %v5108_v16 }
 0x59f   :  { %v4561_v20 = vpop.f32.mrf.mxu1 }
 0x5a1   :  { %v1279_v21 = vpop.f32.mrf.mxu0  ;;  %v1327_v51 = vpop.f32.mrf.mxu1 }
 0x5a2   :  { %v1437_v52 = vpack.c.bf16 %v1279_v21, %v1279_v21  ;;  %v1438_v55 = vpack.c.bf16 %v1327_v51, %v1327_v51 }
 0x5a3   :  { %v4566_v56 = vpop.f32.mrf.mxu0  ;;  %v4572_v59 = vpop.f32.mrf.mxu1 }
 0x5a4   :  { %4613 = vmatmul.mubr.msk.bf16.vlgmr.msra.gmra.mxu0 %vm542_vm6, %v1437_v52  ;;  %4619 = vmatmul.mubr.msk.bf16.vlgmr.msra.gmra.mxu1 %vm542_vm6, %v1438_v55 }
 0x5a5   :  { %v1282_v60 = vpop.f32.mrf.mxu0  ;;  %v1330_v54 = vpop.f32.mrf.mxu1  ;;  %4623 = vmatpush3.bf16.msra.mxu0 %v1537_v32  ;;  %4624 = vmatprep.mubr.msk.bf16.mxu0 %vm5109_vm1, %v5108_v16 }
 0x5a6   :  { %4629 = vmatpush3.bf16.msra.mxu1 %v1583_v29  ;;  %4630 = vmatprep.mubr.msk.bf16.mxu1 %vm5109_vm1, %v5108_v16  ;;  %v5054_v29 = vld [vmem:[%s6063_s2] sm:$0xff]  ;;  %v5055_v54 = vld [vmem:[%s6063_s2 + $0x8] sm:$0xff] }
 0x5a7   :  { %v4567_v61 = vpop.f32.mrf.mxu0  ;;  %v4573_v63 = vpop.f32.mrf.mxu1  ;;  %4634 = vmatprep.subr.bf16.mxu0 %v5108_v16  ;;  %4642 = vmatprep.subr.bf16.mxu1 %v5108_v16 }
 0x5a9   :  { %v1375_v53 = vpop.f32.mrf.mxu0 }
 0x5aa   :  { %v1439_v62 = vpack.c.bf16 %v1375_v53, %v1375_v53 }
 0x5ab   :  { %v4578_v0 = vpop.f32.mrf.mxu0 }
 0x5ac   :  { %4625 = vmatmul.mubr.msk.bf16.vlgmr.msra.gmra.mxu0 %vm542_vm6, %v1439_v62 }
 0x5ad   :  { %v1378_v50 = vpop.f32.mrf.mxu0  ;;  %4638 = vmatprep.mubr.msk.bf16.mxu0 %vm5109_vm1, %v5108_v16 }
 0x5af   :  { %v4579_v1 = vpop.f32.mrf.mxu0 }
 0x5b1   :  { %v1423_v2 = vpop.f32.mrf.mxu1 }
 0x5b2   :  { %v1440_v4 = vpack.c.bf16 %v1423_v2, %v1423_v2 }
 0x5b3   :  { %v4584_v3 = vpop.f32.mrf.mxu1 }
 0x5b4   :  { %4631 = vmatmul.mubr.msk.bf16.vlgmr.msra.gmra.mxu1 %vm542_vm6, %v1440_v4 }
 0x5b5   :  { %v1426_v57 = vpop.f32.mrf.mxu1  ;;  %4646 = vmatprep.mubr.msk.bf16.mxu1 %vm5109_vm1, %v5108_v16 }
 0x5b7   :  { %v4585_v58 = vpop.f32.mrf.mxu1 }
 0x627   :  { %v1527_v5 = vpop.f32.mrf.mxu1 }
 0x628   :  { %v1481_v6 = vpop.f32.mrf.mxu0  ;;  %v1798_v24 = vsel %vm91_vm0, %v1527_v5, 0.0 }
 0x629   :  { %v4596_v7 = vpop.f32.mrf.mxu1  ;;  %v1797_v23 = vsel %vm91_vm0, %v1481_v6, 0.0 }
 0x62a   :  { %v4590_v8 = vpop.f32.mrf.mxu0  ;;  %v1799_v10 = vadd.f32 %v1798_v24, %v1797_v23  ;;  %v5602_v7 = vld [vmem:[%s6067_s6 + $0x8] sm:$0xff]  }
 0x62b   :  { %v1530_v11 = vpop.f32.mrf.mxu1  ;;  %v4945_v8 = vld [vmem:[%s6067_s6 + $0x18] sm:$0xff]   ;;  %4635 = vmatpush3.bf16.msra.mxu0 %v5602_v7 }
 0x62c   :  { %v1484_v12 = vpop.f32.mrf.mxu0  ;;  %4643 = vmatpush3.bf16.msra.mxu1 %v4945_v8  ;;  %4636 = vmatprep.subr.bf16.mxu0 %v5108_v16  ;;  %v5613_v11 = vld [vmem:[%s6067_s6] sm:$0xff]  }
 0x62d   :  { %v4597_v13 = vpop.f32.mrf.mxu1  ;;  %4644 = vmatprep.subr.bf16.mxu1 %v5108_v16  ;;  %v4947_v12 = vld [vmem:[%s6067_s6 + $0x10] sm:$0xff]  }
 0x62e   :  { %v4591_v14 = vpop.f32.mrf.mxu0 }
 0x62f   :  { %4637 = vmatpush3.bf16.msra.mxu0 %v5613_v11 }
 0x630   :  { %v1573_v17 = vpop.f32.mrf.mxu0  ;;  %4645 = vmatpush3.bf16.msra.mxu1 %v4947_v12  ;;  %4650 = vmatprep.subr.bf16.mxu0 %v5108_v16 }
 0x631   :  { %v1800_v26 = vsel %vm91_vm0, %v1573_v17, 0.0  ;;  %4658 = vmatprep.subr.bf16.mxu1 %v5108_v16 }
 0x632   :  { %v4602_v18 = vpop.f32.mrf.mxu0  ;;  %v1801_v15 = vadd.f32 %v1800_v26, %v1799_v10 }
 0x634   :  { %v1576_v19 = vpop.f32.mrf.mxu0 }
 0x636   :  { %v4603_v22 = vpop.f32.mrf.mxu0 }
 0x65c   :  { %v1619_v9 = vpop.f32.mrf.mxu1 }
 0x65d   :  { %v1802_v27 = vsel %vm91_vm0, %v1619_v9, 0.0  ;;  %v1853_v9 = vstv %s5621_s1 }
 0x65e   :  { %v1803_v25 = vadd.f32 %v1802_v27, %v1801_v15  ;;  %v4608_v28 = vpop.f32.mrf.mxu1 }
 0x660   :  { %v5576_v30 = vadd.f32 %v5054_v29, %v1803_v25  ;;  %v1622_v31 = vpop.f32.mrf.mxu1  ;;  %v1856_v25 = vstv %s5623_s20 }
 0x662   :  { %v4609_v32 = vpop.f32.mrf.mxu1  ;;  %v1813_v33 = vsel %vm91_vm0, %v5576_v30, 0.0 }
 0x663   :  { %1814 = vadd.xlane.f32.xlu0 %v1813_v33 }
 0x664   :  { %v1662_v34 = vpop.f32.mrf.mxu0  ;;  %v1705_v35 = vpop.f32.mrf.mxu1 }
 0x665   :  { %v1804_v44 = vsel %vm91_vm0, %v1662_v34, 0.0  ;;  %v1805_v47 = vsel %vm91_vm0, %v1705_v35, 0.0  ;;  %v4948_v34 = vld [vmem:[%s6067_s6 + $0x28] sm:$0xff]   ;;  %v4949_v35 = vld [vmem:[%s6067_s6 + $0x38] sm:$0xff]  }
 0x666   :  { %v4614_v36 = vpop.f32.mrf.mxu0  ;;  %v4620_v37 = vpop.f32.mrf.mxu1  ;;  %v1806_v21 = vadd.f32 %v1805_v47, %v1804_v44 }
 0x668   :  { %v1665_v38 = vpop.f32.mrf.mxu0  ;;  %v1708_v39 = vpop.f32.mrf.mxu1 }
 0x66a   :  { %v4615_v40 = vpop.f32.mrf.mxu0  ;;  %v4621_v41 = vpop.f32.mrf.mxu1 }
 0x66b   :  { %v4950_v40 = vld [vmem:[%s6067_s6 + $0x20] sm:$0xff]   ;;  %v4951_v41 = vld [vmem:[%s6067_s6 + $0x30] sm:$0xff]  }
 0x66c   :  { %v1748_v42 = vpop.f32.mrf.mxu0 }
 0x66d   :  { %v1807_v20 = vsel %vm91_vm0, %v1748_v42, 0.0 }
 0x66e   :  { %v4626_v43 = vpop.f32.mrf.mxu0  ;;  %v1808_v52 = vadd.f32 %v1807_v20, %v1806_v21  ;;  %v4952_v20 = vld [vmem:[%s6068_s7 + $0x8] sm:$0xff]   ;;  %v4953_v21 = vld [vmem:[%s6068_s7 + $0x18] sm:$0xff]  }
 0x670   :  { %v1751_v48 = vpop.f32.mrf.mxu0 }
 0x672   :  { %v4627_v51 = vpop.f32.mrf.mxu0 }
 0x673   :  { %v4954_v51 = vld [vmem:[%s6068_s7] sm:$0xff]  }
 0x674   :  { %v1791_v55 = vpop.f32.mrf.mxu1 }
 0x675   :  { %v1809_v56 = vsel %vm91_vm0, %v1791_v55, 0.0  ;;  %v66_v55 = vld [vmem:[%s6064_s3] sm:$0xff] }
 0x676   :  { %v1810_v59 = vadd.f32 %v1809_v56, %v1808_v52  ;;  %v4632_v60 = vpop.f32.mrf.mxu1  ;;  %v4955_v52 = vld [vmem:[%s6068_s7 + $0x10] sm:$0xff]   ;;  %v67_v56 = vld [vmem:[%s6064_s3 + $0x8] sm:$0xff] }
 0x677   :  { %v4956_v60 = vld [vmem:[%s6068_s7 + $0x28] sm:$0xff]  }
 0x678   :  { %v5587_v61 = vadd.f32 %v5055_v54, %v1810_v59  ;;  %v1794_v63 = vpop.f32.mrf.mxu1  ;;  %v2267_v59 = vpack.c.bf16 %v67_v56, %v66_v55  ;;  %v4957_v54 = vld [vmem:[%s6068_s7 + $0x38] sm:$0xff]  }
 0x679   :  { %v4958_v63 = vld [vmem:[%s6068_s7 + $0x20] sm:$0xff]  }
 0x67a   :  { %v4633_v53 = vpop.f32.mrf.mxu1  ;;  %v1816_v62 = vsel %vm91_vm0, %v5587_v61, 0.0 }
 0x67b   :  { %1817 = vadd.xlane.f32.xlu1 %v1816_v62  ;;  %v4959_v53 = vld [vmem:[%s6068_s7 + $0x30] sm:$0xff]  }
 0x67c   :  { %v68_v62 = vld [vmem:[%s6064_s3 + $0x10] sm:$0xff] }
 0x6ec   :  { %v1815_v0 = vpop.xlane.xlu0 %1814 }
 0x6ed   :  { %v1819_v50 = vmul.f32 0.03125, %v1815_v0  ;;  %v69_v0 = vld [vmem:[%s6064_s3 + $0x18] sm:$0xff]  ;;  %s82_s3 = sld [smem:[#allocation3]] }
 0x6ef   :  { %v1821_v1 = vsub.f32 %v5576_v30, %v1819_v50  ;;  %v2268_v50 = vpack.c.bf16 %v69_v0, %v68_v62 }
 0x6f1   :  { %v1823_v2 = vmul.f32 %v1821_v1, %v1821_v1 }
 0x6f3   :  { %v1825_v4 = vsel %vm91_vm0, %v1823_v2, 0.0 }
 0x6f4   :  { %1826 = vadd.xlane.f32.xlu0 %v1825_v4 }
 0x704   :  { %v1818_v3 = vpop.xlane.xlu1 %1817 }
 0x705   :  { %v1820_v57 = vmul.f32 0.03125, %v1818_v3 }
 0x707   :  { %v5594_v58 = vsub.f32 %v5587_v61, %v1820_v57 }
 0x709   :  { %v1824_v5 = vmul.f32 %v5594_v58, %v5594_v58 }
 0x70b   :  { %v1828_v6 = vsel %vm91_vm0, %v1824_v5, 0.0 }
 0x70c   :  { %1829 = vadd.xlane.f32.xlu0 %v1828_v6 }
 0x77d   :  { %v1827_v13 = vpop.xlane.xlu0 %1826 }
 0x77e   :  { %v1831_v14 = vmul.f32 0.032258064, %v1827_v13 }
 0x780   :  { %5006 = vrsqrt.f32 %v1831_v14  ;;  %vm1835_vm9 = vcmp.eq.f32.partialorder %v1831_v14, inf  ;;  %v1838_v19 = vand.u32 2147483648, %v1831_v14  ;;  %vm1837_vm10 = vcmp.eq.f32.partialorder %v1831_v14, 0.0 }
 0x78d   :  { %v5007_v17 = vpop.eup %5006 }
 0x78e   :  { %v1834_v18 = vmul.f32 %v5007_v17, %v1831_v14 }
 0x790   :  { %v1836_v22 = vsel %vm1835_vm9, %v1831_v14, %v1834_v18 }
 0x791   :  { %v1839_v23 = vsel %vm1837_vm10, %v1838_v19, %v1836_v22 }
 0x792   :  { %v1847_v24 = vadd.f32 1e-06, %v1839_v23 }
 0x794   :  { %5008 = vrcp.f32 %v1847_v24 }
 0x795   :  { %v1830_v26 = vpop.xlane.xlu0 %1829 }
 0x796   :  { %v1832_v10 = vmul.f32 0.032258064, %v1830_v26 }
 0x798   :  { %5010 = vrsqrt.f32 %v1832_v10  ;;  %vm1842_vm11 = vcmp.eq.f32.partialorder %v1832_v10, inf  ;;  %v1845_v33 = vand.u32 2147483648, %v1832_v10  ;;  %vm1844_vm12 = vcmp.eq.f32.partialorder %v1832_v10, 0.0 }
 0x7a1   :  { %v5009_v15 = vpop.eup %5008 }
 0x7a2   :  { %v1850_v27 = vmul.f32 %v5009_v15, %v1821_v1 }
 0x7a4   :  { %v1854_v28 = vmul.f32 %v1853_v9, %v1850_v27 }
 0x7a5   :  { %v5011_v29 = vpop.eup %5010 }
 0x7a6   :  { %v1841_v31 = vmul.f32 %v5011_v29, %v1832_v10  ;;  %v1857_v32 = vadd.f32 %v1856_v25, %v1854_v28 }
 0x7a8   :  { %v1843_v36 = vsel %vm1842_vm11, %v1832_v10, %v1841_v31  ;;  %v1875_v37 = vpack.c.bf16 %v1857_v32, %v1857_v32 }
 0x7a9   :  { %v1846_v38 = vsel %vm1844_vm12, %v1845_v33, %v1843_v36 }
 0x7aa   :  { %v1848_v39 = vadd.f32 1e-06, %v1846_v38  ;;  %4639 = vmatmul.mubr.msk.bf16.vlgmr.msra.gmra.mxu0 %vm91_vm0, %v1875_v37  ;;  %4647 = vmatmul.mubr.msk.bf16.vlgmr.msra.gmra.mxu1 %vm91_vm0, %v1875_v37 }
 0x7ab   :  { %4651 = vmatpush3.bf16.msra.mxu0 %v4948_v34  ;;  %4659 = vmatpush3.bf16.msra.mxu1 %v4949_v35 }
 0x7ac   :  { %5012 = vrcp.f32 %v1848_v39  ;;  %4652 = vmatprep.subr.bf16.mxu0 %v5108_v16  ;;  %4660 = vmatprep.subr.bf16.mxu1 %v5108_v16 }
 0x7ad   :  { %4654 = vmatprep.mubr.msk.bf16.mxu0 %vm5109_vm1, %v5108_v16  ;;  %4662 = vmatprep.mubr.msk.bf16.mxu1 %vm5109_vm1, %v5108_v16 }
 0x7af   :  { %4653 = vmatpush3.bf16.msra.mxu0 %v4950_v40  ;;  %4661 = vmatpush3.bf16.msra.mxu1 %v4951_v41 }
 0x7b0   :  { %4666 = vmatprep.subr.bf16.mxu0 %v5108_v16  ;;  %4674 = vmatprep.subr.bf16.mxu1 %v5108_v16 }
 0x7b2   :  { %4655 = vmatmul.mubr.msk.bf16.vlgmr.msra.gmra.mxu0 %vm91_vm0, %v1875_v37  ;;  %4663 = vmatmul.mubr.msk.bf16.vlgmr.msra.gmra.mxu1 %vm91_vm0, %v1875_v37 }
 0x7b3   :  { %4667 = vmatpush3.bf16.msra.mxu0 %v5602_v7  ;;  %4675 = vmatpush3.bf16.msra.mxu1 %v4945_v8 }
 0x7b4   :  { %4668 = vmatprep.subr.bf16.mxu0 %v5108_v16  ;;  %4676 = vmatprep.subr.bf16.mxu1 %v5108_v16 }
 0x7b5   :  { %4670 = vmatprep.mubr.msk.bf16.mxu0 %vm5109_vm1, %v5108_v16  ;;  %4678 = vmatprep.mubr.msk.bf16.mxu1 %vm5109_vm1, %v5108_v16 }
 0x7b7   :  { %4669 = vmatpush3.bf16.msra.mxu0 %v5613_v11  ;;  %4677 = vmatpush3.bf16.msra.mxu1 %v4947_v12 }
 0x7b8   :  { %4682 = vmatprep.subr.bf16.mxu0 %v5108_v16  ;;  %4690 = vmatprep.subr.bf16.mxu1 %v5108_v16 }
 0x7b9   :  { %v5013_v42 = vpop.eup %5012 }
 0x7ba   :  { %v1852_v43 = vmul.f32 %v5013_v42, %v5594_v58 }
 0x7bc   :  { %v1855_v44 = vmul.f32 %v1853_v9, %v1852_v43 }
 0x7be   :  { %v1858_v47 = vadd.f32 %v1856_v25, %v1855_v44 }
 0x7c0   :  { %v1876_v48 = vpack.c.bf16 %v1858_v47, %v1858_v47 }
 0x7c2   :  { %4671 = vmatmul.mubr.msk.bf16.vlgmr.msra.gmra.mxu0 %vm91_vm0, %v1876_v48  ;;  %4679 = vmatmul.mubr.msk.bf16.vlgmr.msra.gmra.mxu1 %vm91_vm0, %v1876_v48 }
 0x7c3   :  { %4683 = vmatpush3.bf16.msra.mxu0 %v4948_v34  ;;  %4691 = vmatpush3.bf16.msra.mxu1 %v4949_v35 }
 0x7c4   :  { %4684 = vmatprep.subr.bf16.mxu0 %v5108_v16  ;;  %4692 = vmatprep.subr.bf16.mxu1 %v5108_v16 }
 0x7c5   :  { %4686 = vmatprep.mubr.msk.bf16.mxu0 %vm5109_vm1, %v5108_v16  ;;  %4694 = vmatprep.mubr.msk.bf16.mxu1 %vm5109_vm1, %v5108_v16 }
 0x7c7   :  { %4685 = vmatpush3.bf16.msra.mxu0 %v4950_v40  ;;  %4693 = vmatpush3.bf16.msra.mxu1 %v4951_v41 }
 0x7c8   :  { %4698 = vmatprep.subr.bf16.mxu0 %v5108_v16  ;;  %4706 = vmatprep.subr.bf16.mxu1 %v5108_v16 }
 0x7ca   :  { %4687 = vmatmul.mubr.msk.bf16.vlgmr.msra.gmra.mxu0 %vm91_vm0, %v1876_v48  ;;  %4695 = vmatmul.mubr.msk.bf16.vlgmr.msra.gmra.mxu1 %vm91_vm0, %v1876_v48 }
 0x7cb   :  { %4699 = vmatpush3.bf16.msra.mxu0 %v4952_v20  ;;  %4707 = vmatpush3.bf16.msra.mxu1 %v4953_v21 }
 0x7cc   :  { %4700 = vmatprep.subr.bf16.mxu0 %v5108_v16  ;;  %4708 = vmatprep.subr.bf16.mxu1 %v5108_v16 }
 0x7cd   :  { %4702 = vmatprep.mubr.msk.bf16.mxu0 %vm5109_vm1, %v5108_v16  ;;  %4710 = vmatprep.mubr.msk.bf16.mxu1 %vm5109_vm1, %v5108_v16 }
 0x7cf   :  { %4701 = vmatpush3.bf16.msra.mxu0 %v4954_v51  ;;  %4709 = vmatpush3.bf16.msra.mxu1 %v4955_v52 }
 0x7d0   :  { %4714 = vmatprep.subr.bf16.mxu0 %v5108_v16  ;;  %4722 = vmatprep.subr.bf16.mxu1 %v5108_v16 }
 0x7d2   :  { %4703 = vmatmul.mubr.msk.bf16.vlgmr.msra.gmra.mxu0 %vm91_vm0, %v2267_v59  ;;  %4711 = vmatmul.mubr.msk.bf16.vlgmr.msra.gmra.mxu1 %vm91_vm0, %v2267_v59 }
 0x7d3   :  { %4715 = vmatpush3.bf16.msra.mxu0 %v4956_v60  ;;  %4723 = vmatpush3.bf16.msra.mxu1 %v4957_v54 }
 0x7d4   :  { %4716 = vmatprep.subr.bf16.mxu0 %v5108_v16  ;;  %4724 = vmatprep.subr.bf16.mxu1 %v5108_v16 }
 0x7d5   :  { %4718 = vmatprep.mubr.msk.bf16.mxu0 %vm5109_vm1, %v5108_v16  ;;  %4726 = vmatprep.mubr.msk.bf16.mxu1 %vm5109_vm1, %v5108_v16 }
 0x7d7   :  { %4717 = vmatpush3.bf16.msra.mxu0 %v4958_v63  ;;  %4725 = vmatpush3.bf16.msra.mxu1 %v4959_v53 }
 0x7d8   :  { %4730 = vmatprep.subr.bf16.mxu0 %v5108_v16  ;;  %4738 = vmatprep.subr.bf16.mxu1 %v5108_v16 }
 0x7da   :  { %4719 = vmatmul.mubr.msk.bf16.vlgmr.msra.gmra.mxu0 %vm91_vm0, %v2267_v59  ;;  %4727 = vmatmul.mubr.msk.bf16.vlgmr.msra.gmra.mxu1 %vm91_vm0, %v2267_v59 }
 0x7db   :  { %4731 = vmatpush3.bf16.msra.mxu0 %v4952_v20  ;;  %4739 = vmatpush3.bf16.msra.mxu1 %v4953_v21 }
 0x7dc   :  { %4732 = vmatprep.subr.bf16.mxu0 %v5108_v16  ;;  %4740 = vmatprep.subr.bf16.mxu1 %v5108_v16 }
 0x7dd   :  { %4734 = vmatprep.mubr.msk.bf16.mxu0 %vm5109_vm1, %v5108_v16  ;;  %4742 = vmatprep.mubr.msk.bf16.mxu1 %vm5109_vm1, %v5108_v16 }
 0x7df   :  { %4733 = vmatpush3.bf16.msra.mxu0 %v4954_v51  ;;  %4741 = vmatpush3.bf16.msra.mxu1 %v4955_v52 }
 0x7e0   :  { %4746 = vmatprep.subr.bf16.mxu0 %v5108_v16  ;;  %4754 = vmatprep.subr.bf16.mxu1 %v5108_v16 }
 0x7e2   :  { %4735 = vmatmul.mubr.msk.bf16.vlgmr.msra.gmra.mxu0 %vm91_vm0, %v2268_v50  ;;  %4743 = vmatmul.mubr.msk.bf16.vlgmr.msra.gmra.mxu1 %vm91_vm0, %v2268_v50 }
 0x7e3   :  { %4747 = vmatpush3.bf16.msra.mxu0 %v4956_v60  ;;  %4755 = vmatpush3.bf16.msra.mxu1 %v4957_v54 }
 0x7e4   :  { %4748 = vmatprep.subr.bf16.mxu0 %v5108_v16  ;;  %4756 = vmatprep.subr.bf16.mxu1 %v5108_v16 }
 0x7e5   :  { %4750 = vmatprep.mubr.msk.bf16.mxu0 %vm5109_vm1, %v5108_v16  ;;  %4758 = vmatprep.mubr.msk.bf16.mxu1 %vm5109_vm1, %v5108_v16 }
 0x7e7   :  { %4749 = vmatpush3.bf16.msra.mxu0 %v4958_v63  ;;  %4757 = vmatpush3.bf16.msra.mxu1 %v4959_v53 }
 0x7e8   :  { %4762 = vmatprep.subr.bf16.mxu0 %v5108_v16  ;;  %4768 = vmatprep.subr.bf16.mxu1 %v5108_v16 }
 0x7ea   :  { %4751 = vmatmul.mubr.msk.bf16.vlgmr.msra.gmra.mxu0 %vm91_vm0, %v2268_v50  ;;  %4759 = vmatmul.mubr.msk.bf16.vlgmr.msra.gmra.mxu1 %vm91_vm0, %v2268_v50 }
 0x7eb   :  { %4764 = vmatprep.mubr.msk.bf16.mxu0 %vm5109_vm1, %v5108_v16  ;;  %4770 = vmatprep.mubr.msk.bf16.mxu1 %vm5109_vm1, %v5108_v16 }
 0x86a   :  { %v5754_v1 = vpop.f32.mrf.mxu0  ;;  %v5756_v2 = vpop.f32.mrf.mxu1 }
 0x86b   :  { %v2651_v59 = vpack.c.bf16 %v5754_v1, %v5754_v1  ;;  %v2652_v60 = vpack.c.bf16 %v5756_v2, %v5756_v2 }
 0x86c   :  { %v4640_v4 = vpop.f32.mrf.mxu0  ;;  %v4648_v3 = vpop.f32.mrf.mxu1 }
 0x86e   :  { %v1929_v57 = vpop.f32.mrf.mxu0  ;;  %v1981_v58 = vpop.f32.mrf.mxu1 }
 0x870   :  { %v4641_v5 = vpop.f32.mrf.mxu0  ;;  %v4649_v6 = vpop.f32.mrf.mxu1 }
 0x872   :  { %v5758_v7 = vpop.f32.mrf.mxu0  ;;  %v5760_v8 = vpop.f32.mrf.mxu1 }
 0x873   :  { %v2653_v5 = vpack.c.bf16 %v5758_v7, %v5758_v7  ;;  %v2654_v6 = vpack.c.bf16 %v5760_v8, %v5760_v8 }
 0x874   :  { %v4656_v11 = vpop.f32.mrf.mxu0  ;;  %v4664_v12 = vpop.f32.mrf.mxu1 }
 0x876   :  { %v2033_v13 = vpop.f32.mrf.mxu0  ;;  %v2085_v14 = vpop.f32.mrf.mxu1 }
 0x878   :  { %v4657_v17 = vpop.f32.mrf.mxu0  ;;  %v4665_v18 = vpop.f32.mrf.mxu1 }
 0x882   :  { %v5762_v19 = vpop.f32.mrf.mxu0  ;;  %v5764_v22 = vpop.f32.mrf.mxu1 }
 0x884   :  { %v4672_v23 = vpop.f32.mrf.mxu0  ;;  %v4680_v24 = vpop.f32.mrf.mxu1 }
 0x886   :  { %v2128_v26 = vpop.f32.mrf.mxu0  ;;  %v2168_v10 = vpop.f32.mrf.mxu1 }
 0x888   :  { %v4673_v15 = vpop.f32.mrf.mxu0  ;;  %v4681_v9 = vpop.f32.mrf.mxu1 }
 0x889   :  { %v2655_v15 = vpack.c.bf16 %v5762_v19, %v5762_v19  ;;  %v2656_v9 = vpack.c.bf16 %v5764_v22, %v5764_v22 }
 0x88a   :  { %v5766_v27 = vpop.f32.mrf.mxu0  ;;  %v5768_v25 = vpop.f32.mrf.mxu1 }
 0x88b   :  { %v2657_v19 = vpack.c.bf16 %v5766_v27, %v5766_v27  ;;  %v2658_v22 = vpack.c.bf16 %v5768_v25, %v5768_v25 }
 0x88c   :  { %v4688_v28 = vpop.f32.mrf.mxu0  ;;  %v4696_v29 = vpop.f32.mrf.mxu1 }
 0x88e   :  { %v2208_v31 = vpop.f32.mrf.mxu0  ;;  %v2248_v32 = vpop.f32.mrf.mxu1 }
 0x890   :  { %v4689_v33 = vpop.f32.mrf.mxu0  ;;  %v4697_v34 = vpop.f32.mrf.mxu1 }
 0x892   :  { %v2318_v35 = vpop.f32.mrf.mxu0  ;;  %v2371_v36 = vpop.f32.mrf.mxu1 }
 0x894   :  { %v4704_v37 = vpop.f32.mrf.mxu0  ;;  %v4712_v38 = vpop.f32.mrf.mxu1 }
 0x896   :  { %v2321_v39 = vpop.f32.mrf.mxu0  ;;  %v2374_v40 = vpop.f32.mrf.mxu1 }
 0x897   :  { %v5770_v41 = vpack.c.bf16 %v2321_v39, %v2318_v35  ;;  %v5772_v42 = vpack.c.bf16 %v2374_v40, %v2371_v36  ;;  %v83_v35 = vstv %s82_s3  ;;  %v3045_v36 = vsub.s32 0, %v5376_v45 }
 0x898   :  { %v4705_v43 = vpop.f32.mrf.mxu0  ;;  %v4713_v44 = vpop.f32.mrf.mxu1  ;;  %vm84_vm13 = vcmp.lt.s32.totalorder %v5378_v46, %v83_v35 }
 0x899   :  { %v2671_v47 = vsel %vm542_vm6, %v5770_v41, 0  ;;  %v2717_v48 = vsel %vm542_vm6, %v5772_v42, 0  ;;  %v85_v27 = vsel %vm84_vm13, 0.0, %v5111_v49 }
 0x89a   :  { %v2424_v20 = vpop.f32.mrf.mxu0  ;;  %v2477_v21 = vpop.f32.mrf.mxu1  ;;  %4763 = vmatpush3.bf16.xpose.msra.mxu0 %v2671_v47  ;;  %4769 = vmatpush3.bf16.xpose.msra.mxu1 %v2717_v48  ;;  %v3046_v25 = vrot.slane %v85_v27, %v3045_v36 }
 0x89b   :  { %4774 = vmatprep.subr.bf16.mxu0 %v5108_v16  ;;  %4780 = vmatprep.subr.bf16.mxu1 %v5108_v16 }
 0x89c   :  { %v4720_v51 = vpop.f32.mrf.mxu0  ;;  %v4728_v52 = vpop.f32.mrf.mxu1 }
 0x89e   :  { %v2427_v55 = vpop.f32.mrf.mxu0  ;;  %v2480_v56 = vpop.f32.mrf.mxu1 }
 0x89f   :  { %v5784_v54 = vpack.c.bf16 %v2427_v55, %v2424_v20  ;;  %v5786_v63 = vpack.c.bf16 %v2480_v56, %v2477_v21  ;;  %v88_v56 = vstv %s4143_s28 }
 0x8a0   :  { %v4721_v53 = vpop.f32.mrf.mxu0  ;;  %v4729_v62 = vpop.f32.mrf.mxu1  ;;  %vm89_vm15 = vcmp.lt.s32.totalorder %v5378_v46, %v88_v56 }
 0x8a1   :  { %v2763_v0 = vsel %vm542_vm6, %v5784_v54, 0  ;;  %v2809_v50 = vsel %vm542_vm6, %v5786_v63, 0  ;;  %4765 = vmatmul.mubr.msk.bf16.vlgmr.msra.gmra.mxu0 %vm542_vm6, %v2651_v59  ;;  %4771 = vmatmul.mubr.msk.bf16.vlgmr.msra.gmra.mxu1 %vm542_vm6, %v2652_v60 }
 0x8a2   :  { %v2521_v1 = vpop.f32.mrf.mxu0  ;;  %v2562_v4 = vpop.f32.mrf.mxu1  ;;  %4775 = vmatpush3.bf16.xpose.msra.mxu0 %v2763_v0  ;;  %4781 = vmatpush3.bf16.xpose.msra.mxu1 %v2809_v50 }
 0x8a3   :  { %4776 = vmatprep.mubr.msk.bf16.mxu0 %vm5109_vm1, %v5108_v16  ;;  %4782 = vmatprep.mubr.msk.bf16.mxu1 %vm5109_vm1, %v5108_v16 }
 0x8a4   :  { %v4736_v2 = vpop.f32.mrf.mxu0  ;;  %v4744_v3 = vpop.f32.mrf.mxu1  ;;  %4786 = vmatprep.subr.bf16.mxu0 %v5108_v16  ;;  %4792 = vmatprep.subr.bf16.mxu1 %v5108_v16 }
 0x8a6   :  { %v2524_v57 = vpop.f32.mrf.mxu0  ;;  %v2565_v58 = vpop.f32.mrf.mxu1 }
 0x8a7   :  { %v5804_v11 = vpack.c.bf16 %v2524_v57, %v2521_v1  ;;  %v5806_v12 = vpack.c.bf16 %v2565_v58, %v2562_v4  ;;  %v90_v57 = vsel %vm89_vm15, 0.0, %v5111_v49 }
 0x8a8   :  { %v4737_v13 = vpop.f32.mrf.mxu0  ;;  %v4745_v14 = vpop.f32.mrf.mxu1 }
 0x8a9   :  { %v2855_v17 = vsel %vm542_vm6, %v5804_v11, 0  ;;  %v2901_v18 = vsel %vm542_vm6, %v5806_v12, 0  ;;  %4777 = vmatmul.mubr.msk.bf16.vlgmr.msra.gmra.mxu0 %vm542_vm6, %v2653_v5  ;;  %4783 = vmatmul.mubr.msk.bf16.vlgmr.msra.gmra.mxu1 %vm542_vm6, %v2654_v6  ;;  %v3050_v14 = vrot.slane %v90_v57, %v3045_v36 }
 0x8aa   :  { %v2603_v7 = vpop.f32.mrf.mxu0  ;;  %v2644_v23 = vpop.f32.mrf.mxu1  ;;  %4787 = vmatpush3.bf16.xpose.msra.mxu0 %v2855_v17  ;;  %4793 = vmatpush3.bf16.xpose.msra.mxu1 %v2901_v18 }
 0x8ab   :  { %4788 = vmatprep.mubr.msk.bf16.mxu0 %vm5109_vm1, %v5108_v16  ;;  %4794 = vmatprep.mubr.msk.bf16.mxu1 %vm5109_vm1, %v5108_v16 }
 0x8ac   :  { %v4752_v8 = vpop.f32.mrf.mxu0  ;;  %v4760_v24 = vpop.f32.mrf.mxu1  ;;  %4798 = vmatprep.subr.bf16.mxu0 %v5108_v16  ;;  %4804 = vmatprep.subr.bf16.mxu1 %v5108_v16 }
 0x8ae   :  { %v2606_v26 = vpop.f32.mrf.mxu0  ;;  %v2647_v10 = vpop.f32.mrf.mxu1 }
 0x8af   :  { %v5824_v28 = vpack.c.bf16 %v2606_v26, %v2603_v7  ;;  %v5826_v29 = vpack.c.bf16 %v2647_v10, %v2644_v23 }
 0x8b0   :  { %v4753_v31 = vpop.f32.mrf.mxu0  ;;  %v4761_v32 = vpop.f32.mrf.mxu1 }
 0x8b1   :  { %v2947_v33 = vsel %vm542_vm6, %v5824_v28, 0  ;;  %v2993_v34 = vsel %vm542_vm6, %v5826_v29, 0  ;;  %4789 = vmatmul.mubr.msk.bf16.vlgmr.msra.gmra.mxu0 %vm542_vm6, %v2655_v15  ;;  %4795 = vmatmul.mubr.msk.bf16.vlgmr.msra.gmra.mxu1 %vm542_vm6, %v2656_v9 }
 0x8b2   :  { %4799 = vmatpush3.bf16.xpose.msra.mxu0 %v2947_v33  ;;  %4805 = vmatpush3.bf16.xpose.msra.mxu1 %v2993_v34 }
 0x8b3   :  { %4800 = vmatprep.mubr.msk.bf16.mxu0 %vm5109_vm1, %v5108_v16  ;;  %4806 = vmatprep.mubr.msk.bf16.mxu1 %vm5109_vm1, %v5108_v16 }
 0x8b4   :  { %4816 = vmatprep.subr.bf16.mxu1 %v5108_v16  ;;  %4810 = vmatprep.subr.bf16.mxu0 %v5108_v16 }
 0x8b9   :  { %4801 = vmatmul.mubr.msk.bf16.vlgmr.msra.gmra.mxu0 %vm542_vm6, %v2657_v19  ;;  %4807 = vmatmul.mubr.msk.bf16.vlgmr.msra.gmra.mxu1 %vm542_vm6, %v2658_v22 }
 0x8ba   :  { %4812 = vmatprep.mubr.msk.bf16.mxu0 %vm5109_vm1, %v5108_v16  ;;  %4818 = vmatprep.mubr.msk.bf16.mxu1 %vm5109_vm1, %v5108_v16 }
 0x961   :  { %v2707_v37 = vpop.f32.mrf.mxu0  ;;  %v2753_v38 = vpop.f32.mrf.mxu1 }
 0x962   :  { %v3035_v39 = vmul.f32 0.35355338, %v2707_v37  ;;  %v3036_v40 = vmul.f32 0.35355338, %v2753_v38 }
 0x963   :  { %v4766_v43 = vpop.f32.mrf.mxu0  ;;  %v4772_v44 = vpop.f32.mrf.mxu1 }
 0x964   :  { %v5853_v47 = vadd.f32 %v3046_v25, %v3036_v40  ;;  %v5855_v48 = vadd.f32 %v3046_v25, %v3035_v39 }
 0x965   :  { %v2710_v20 = vpop.f32.mrf.mxu0  ;;  %v2756_v21 = vpop.f32.mrf.mxu1 }
 0x966   :  { %v3063_v45 = vsel %vm3059_vm14, %v5853_v47, -inf  ;;  %v3060_v51 = vsel %vm3059_vm14, %v5855_v48, -inf }
 0x967   :  { %3064 = vmax.xlane.f32.xlu1 %v3063_v45  ;;  %v4773_v52 = vpop.f32.mrf.mxu1  ;;  %3061 = vmax.xlane.f32.xlu0 %v3060_v51  ;;  %v4767_v55 = vpop.f32.mrf.mxu0 }
 0x969   :  { %v2799_v59 = vpop.f32.mrf.mxu0  ;;  %v2845_v60 = vpop.f32.mrf.mxu1 }
 0x96a   :  { %v3037_v53 = vmul.f32 0.35355338, %v2799_v59  ;;  %v3038_v62 = vmul.f32 0.35355338, %v2845_v60 }
 0x96b   :  { %v4778_v0 = vpop.f32.mrf.mxu0  ;;  %v4784_v50 = vpop.f32.mrf.mxu1 }
 0x96c   :  { %v5862_v1 = vadd.f32 %v3046_v25, %v3038_v62  ;;  %v3053_v4 = vadd.f32 %v3046_v25, %v3037_v53 }
 0x96d   :  { %v2802_v2 = vpop.f32.mrf.mxu0  ;;  %v2848_v3 = vpop.f32.mrf.mxu1 }
 0x96e   :  { %v3069_v58 = vsel %vm3059_vm14, %v5862_v1, -inf  ;;  %v3066_v5 = vsel %vm3059_vm14, %v3053_v4, -inf }
 0x96f   :  { %3070 = vmax.xlane.f32.xlu1 %v3069_v58  ;;  %v4785_v6 = vpop.f32.mrf.mxu1  ;;  %3067 = vmax.xlane.f32.xlu0 %v3066_v5  ;;  %v4779_v13 = vpop.f32.mrf.mxu0 }
 0x971   :  { %v2891_v46 = vpop.f32.mrf.mxu0  ;;  %v2937_v17 = vpop.f32.mrf.mxu1 }
 0x972   :  { %v3039_v18 = vmul.f32 0.35355338, %v2891_v46  ;;  %v3040_v7 = vmul.f32 0.35355338, %v2937_v17 }
 0x973   :  { %v4790_v23 = vpop.f32.mrf.mxu0  ;;  %v4796_v8 = vpop.f32.mrf.mxu1 }
 0x974   :  { %v5868_v24 = vadd.f32 %v3050_v14, %v3040_v7  ;;  %v5870_v26 = vadd.f32 %v3050_v14, %v3039_v18 }
 0x975   :  { %v2894_v49 = vpop.f32.mrf.mxu0  ;;  %v2940_v10 = vpop.f32.mrf.mxu1 }
 0x976   :  { %v3075_v15 = vsel %vm3059_vm14, %v5868_v24, -inf  ;;  %v3072_v9 = vsel %vm3059_vm14, %v5870_v26, -inf }
 0x977   :  { %3076 = vmax.xlane.f32.xlu1 %v3075_v15  ;;  %v4797_v31 = vpop.f32.mrf.mxu1  ;;  %3073 = vmax.xlane.f32.xlu0 %v3072_v9  ;;  %v4791_v32 = vpop.f32.mrf.mxu0 }
 0x979   :  { %v2983_v33 = vpop.f32.mrf.mxu0  ;;  %v3029_v34 = vpop.f32.mrf.mxu1 }
 0x97a   :  { %v3041_v19 = vmul.f32 0.35355338, %v2983_v33  ;;  %v3042_v40 = vmul.f32 0.35355338, %v3029_v34 }
 0x97b   :  { %v4802_v22 = vpop.f32.mrf.mxu0  ;;  %v4808_v35 = vpop.f32.mrf.mxu1 }
 0x97c   :  { %v3057_v36 = vadd.f32 %v3050_v14, %v3041_v19  ;;  %v3058_v43 = vadd.f32 %v3050_v14, %v3042_v40 }
 0x97d   :  { %v2986_v27 = vpop.f32.mrf.mxu0  ;;  %v3032_v25 = vpop.f32.mrf.mxu1 }
 0x97e   :  { %v3078_v37 = vsel %vm3059_vm14, %v3057_v36, -inf  ;;  %v3081_v44 = vsel %vm3059_vm14, %v3058_v43, -inf }
 0x97f   :  { %v4809_v38 = vpop.f32.mrf.mxu1  ;;  %3079 = vmax.xlane.f32.xlu0 %v3078_v37  ;;  %v4803_v39 = vpop.f32.mrf.mxu0 }
 0x988   :  { %3204 = vrot.lane.b32.xlu1 %v5772_v42, %s5110_s4 }
 0x98c   :  { %3251 = vrot.lane.b32.xlu1 %v5784_v54, %s5110_s4 }
 0x995   :  { %3157 = vrot.lane.b32.xlu0 %v5770_v41, %s5110_s4 }
 0x9b0   :  { %3082 = vmax.xlane.f32.xlu1 %v3081_v44 }
 0x9c1   :  { %3298 = vrot.lane.b32.xlu1 %v5786_v63, %s5110_s4 }
 0x9f0   :  { %v3065_v20 = vpop.xlane.xlu1 %3064  ;;  %v3062_v21 = vpop.xlane.xlu0 %3061 }
 0x9f1   :  { %v3085_v45 = vsub.f32 %v5853_v47, %v3065_v20  ;;  %v3084_v42 = vsub.f32 %v5855_v48, %v3062_v21 }
 0x9f3   :  { %v3094_v51 = vmul.f32 1.442695, %v3085_v45  ;;  %v3092_v52 = vmul.f32 1.442695, %v3084_v42 }
 0x9f5   :  { %5014 = vpow2.f32 %v3094_v51 }
 0x9f6   :  { %5016 = vpow2.f32 %v3092_v52 }
 0x9f8   :  { %v3068_v54 = vpop.xlane.xlu0 %3067  ;;  %v3071_v56 = vpop.xlane.xlu1 %3070 }
 0x9f9   :  { %v3086_v41 = vsub.f32 %v3053_v4, %v3068_v54  ;;  %v3087_v3 = vsub.f32 %v5862_v1, %v3071_v56 }
 0x9fb   :  { %v3096_v55 = vmul.f32 1.442695, %v3086_v41  ;;  %v3098_v57 = vmul.f32 1.442695, %v3087_v3 }
 0x9fd   :  { %5018 = vpow2.f32 %v3096_v55 }
 0x9fe   :  { %5020 = vpow2.f32 %v3098_v57 }
 0xa00   :  { %v3077_v59 = vpop.xlane.xlu1 %3076  ;;  %v3074_v62 = vpop.xlane.xlu0 %3073 }
 0xa01   :  { %v3089_v58 = vsub.f32 %v5868_v24, %v3077_v59  ;;  %v3088_v6 = vsub.f32 %v5870_v26, %v3074_v62 }
 0xa02   :  { %v5015_v60 = vpop.eup %5014 }
 0xa03   :  { %v5017_v53 = vpop.eup %5016  ;;  %v3111_v63 = vsel %vm3059_vm14, %v5015_v60, 0.0  ;;  %v3102_v5 = vmul.f32 1.442695, %v3089_v58  ;;  %v3100_v13 = vmul.f32 1.442695, %v3088_v6 }
 0xa04   :  { %v3205_v0 = vpop.permute.xlu1 %3204  ;;  %3112 = vadd.xlane.f32.xlu1 %v3111_v63  ;;  %v3108_v47 = vsel %vm3059_vm14, %v5017_v53, 0.0  ;;  %v3535_v58 = vld [vmem:[%s6069_s8 + $0xc] sm:$0xf] }
 0xa05   :  { %3109 = vadd.xlane.f32.xlu0 %v3108_v47  ;;  %4817 = vmatpush3.bf16.msra.mxu1 %v3205_v0  ;;  %5022 = vpow2.f32 %v3102_v5  ;;  %v3532_v0 = vld [vmem:[%s6069_s8] sm:$0xf]  ;;  %v3534_v5 = vld [vmem:[%s6069_s8 + $0x8] sm:$0xf] }
 0xa06   :  { %4828 = vmatprep.subr.bf16.mxu1 %v5108_v16  ;;  %5024 = vpow2.f32 %v3100_v13 }
 0xa08   :  { %v3080_v48 = vpop.xlane.xlu0 %3079  ;;  %v3252_v18 = vpop.permute.xlu1 %3251 }
 0xa09   :  { %v3090_v14 = vsub.f32 %v3057_v36, %v3080_v48 }
 0xa0a   :  { %v5891_v50 = vpop.eup %5018 }
 0xa0b   :  { %v3114_v4 = vsel %vm3059_vm14, %v5891_v50, 0.0  ;;  %v3104_v46 = vmul.f32 1.442695, %v3090_v14  ;;  %v5021_v17 = vpop.eup %5020 }
 0xa0c   :  { %v3158_v2 = vpop.permute.xlu0 %3157  ;;  %3115 = vadd.xlane.f32.xlu0 %v3114_v4  ;;  %v3533_v4 = vld [vmem:[%s6069_s8 + $0x4] sm:$0xf] }
 0xa0d   :  { %4811 = vmatpush3.bf16.msra.mxu0 %v3158_v2  ;;  %5026 = vpow2.f32 %v3104_v46  ;;  %v3594_v57 = vsel %vm1049_vm8, %v3533_v4, 0  ;;  %v3686_v46 = vsel %vm1049_vm8, %v3535_v58, 0 }
 0xa0e   :  { %4822 = vmatprep.subr.bf16.mxu0 %v5108_v16 }
 0xa12   :  { %v5904_v1 = vpop.eup %5022 }
 0xa13   :  { %v3123_v8 = vsel %vm3059_vm14, %v5904_v1, 0.0  ;;  %v5025_v24 = vpop.eup %5024 }
 0xa14   :  { %v3120_v26 = vsel %vm3059_vm14, %v5025_v24, 0.0 }
 0xa15   :  { %3392 = vrot.lane.b32.xlu1 %v5806_v12, %s5110_s4  ;;  %v3117_v12 = vsel %vm3059_vm14, %v5021_v17, 0.0 }
 0xa1a   :  { %v5909_v49 = vpop.eup %5026 }
 0xa1b   :  { %v3126_v10 = vsel %vm3059_vm14, %v5909_v49, 0.0 }
 0xa22   :  { %3345 = vrot.lane.b32.xlu0 %v5804_v11, %s5110_s4 }
 0xa39   :  { %3118 = vadd.xlane.f32.xlu1 %v3117_v12  ;;  %v3083_v11 = vpop.xlane.xlu1 %3082  ;;  %v3640_v12 = vsel %vm1049_vm8, %v3534_v5, 0 }
 0xa3a   :  { %v3091_v7 = vsub.f32 %v3058_v43, %v3083_v11 }
 0xa3c   :  { %v3106_v23 = vmul.f32 1.442695, %v3091_v7 }
 0xa3d   :  { %3124 = vadd.xlane.f32.xlu1 %v3123_v8  ;;  %v3299_v31 = vpop.permute.xlu1 %3298 }
 0xa3e   :  { %5028 = vpow2.f32 %v3106_v23 }
 0xa41   :  { %3121 = vadd.xlane.f32.xlu0 %v3120_v26 }
 0xa45   :  { %3127 = vadd.xlane.f32.xlu0 %v3126_v10 }
 0xa4b   :  { %v5913_v15 = vpop.eup %5028 }
 0xa4c   :  { %v3129_v9 = vsel %vm3059_vm14, %v5913_v15, 0.0 }
 0xa4d   :  { %3130 = vadd.xlane.f32.xlu1 %v3129_v9 }
 0xa5b   :  { %3439 = vrot.lane.b32.xlu0 %v5824_v28, %s5110_s4 }
 0xa5e   :  { %3486 = vrot.lane.b32.xlu1 %v5826_v29, %s5110_s4 }
 0xa8d   :  { %v3113_v32 = vpop.xlane.xlu1 %3112 }
 0xa8e   :  { %5030 = vrcp.f32 %v3113_v32  ;;  %v3110_v33 = vpop.xlane.xlu0 %3109 }
 0xa8f   :  { %5032 = vrcp.f32 %v3110_v33 }
 0xa91   :  { %v3393_v39 = vpop.permute.xlu1 %3392 }
 0xa95   :  { %v3116_v34 = vpop.xlane.xlu0 %3115 }
 0xa96   :  { %5034 = vrcp.f32 %v3116_v34 }
 0xa99   :  { %v3346_v38 = vpop.permute.xlu0 %3345 }
 0xa9b   :  { %v5031_v19 = vpop.eup %5030 }
 0xa9c   :  { %v5033_v22 = vpop.eup %5032  ;;  %v3141_v35 = vmul.f32 %v5031_v19, %v5015_v60 }
 0xa9d   :  { %v3140_v36 = vmul.f32 %v5033_v22, %v5017_v53 }
 0xa9e   :  { %v3149_v27 = vpack.c.bf16 %v3141_v35, %v3141_v35 }
 0xa9f   :  { %v3148_v25 = vpack.c.bf16 %v3140_v36, %v3140_v36 }
 0xaa0   :  { %4819 = vmatmul.mubr.msk.bf16.vlgmr.msra.gmra.mxu1 %vm3059_vm14, %v3149_v27 }
 0xaa1   :  { %4813 = vmatmul.mubr.msk.bf16.vlgmr.msra.gmra.mxu0 %vm3059_vm14, %v3148_v25  ;;  %4829 = vmatpush3.bf16.msra.mxu1 %v3299_v31 }
 0xaa2   :  { %4823 = vmatpush3.bf16.msra.mxu0 %v3252_v18  ;;  %4824 = vmatprep.mubr.msk.bf16.mxu0 %vm5109_vm1, %v5108_v16 }
 0xaa3   :  { %4834 = vmatprep.subr.bf16.mxu0 %v5108_v16  ;;  %4830 = vmatprep.mubr.msk.bf16.mxu1 %vm5109_vm1, %v5108_v16  ;;  %v5035_v28 = vpop.eup %5034 }
 0xaa4   :  { %4840 = vmatprep.subr.bf16.mxu1 %v5108_v16  ;;  %v3142_v29 = vmul.f32 %v5035_v28, %v5891_v50  ;;  %v3548_v50 = vsel %vm1049_vm8, %v3532_v0, 0 }
 0xaa6   :  { %v3150_v37 = vpack.c.bf16 %v3142_v29, %v3142_v29 }
 0xaa9   :  { %4825 = vmatmul.mubr.msk.bf16.vlgmr.msra.gmra.mxu0 %vm3059_vm14, %v3150_v37 }
 0xaaa   :  { %4835 = vmatpush3.bf16.msra.mxu0 %v3346_v38  ;;  %4836 = vmatprep.mubr.msk.bf16.mxu0 %vm5109_vm1, %v5108_v16 }
 0xaab   :  { %4846 = vmatprep.subr.bf16.mxu0 %v5108_v16 }
 0xac2   :  { %v3119_v40 = vpop.xlane.xlu1 %3118 }
 0xac3   :  { %5036 = vrcp.f32 %v3119_v40 }
 0xac6   :  { %v3125_v43 = vpop.xlane.xlu1 %3124 }
 0xac7   :  { %5038 = vrcp.f32 %v3125_v43 }
 0xaca   :  { %v3122_v44 = vpop.xlane.xlu0 %3121 }
 0xacb   :  { %5040 = vrcp.f32 %v3122_v44 }
 0xace   :  { %v3128_v20 = vpop.xlane.xlu0 %3127 }
 0xacf   :  { %5042 = vrcp.f32 %v3128_v20 }
 0xad0   :  { %v5037_v21 = vpop.eup %5036 }
 0xad1   :  { %v3143_v45 = vmul.f32 %v5037_v21, %v5021_v17 }
 0xad2   :  { %v3440_v63 = vpop.permute.xlu0 %3439 }
 0xad3   :  { %v3151_v42 = vpack.c.bf16 %v3143_v45, %v3143_v45 }
 0xad4   :  { %v5039_v51 = vpop.eup %5038 }
 0xad5   :  { %4831 = vmatmul.mubr.msk.bf16.vlgmr.msra.gmra.mxu1 %vm3059_vm14, %v3151_v42  ;;  %v3145_v54 = vmul.f32 %v5039_v51, %v5904_v1 }
 0xad6   :  { %4841 = vmatpush3.bf16.msra.mxu1 %v3393_v39  ;;  %v3131_v52 = vpop.xlane.xlu1 %3130  ;;  %4842 = vmatprep.mubr.msk.bf16.mxu1 %vm5109_vm1, %v5108_v16 }
 0xad7   :  { %5044 = vrcp.f32 %v3131_v52  ;;  %4852 = vmatprep.subr.bf16.mxu1 %v5108_v16  ;;  %v3153_v56 = vpack.c.bf16 %v3145_v54, %v3145_v54 }
 0xad8   :  { %v5041_v41 = vpop.eup %5040 }
 0xad9   :  { %v3144_v55 = vmul.f32 %v5041_v41, %v5025_v24 }
 0xada   :  { %v3487_v53 = vpop.permute.xlu1 %3486 }
 0xadb   :  { %v3152_v59 = vpack.c.bf16 %v3144_v55, %v3144_v55 }
 0xadc   :  { %v5043_v60 = vpop.eup %5042 }
 0xadd   :  { %4843 = vmatmul.mubr.msk.bf16.vlgmr.msra.gmra.mxu1 %vm3059_vm14, %v3153_v56  ;;  %4837 = vmatmul.mubr.msk.bf16.vlgmr.msra.gmra.mxu0 %vm3059_vm14, %v3152_v59  ;;  %v3146_v62 = vmul.f32 %v5043_v60, %v5909_v49 }
 0xade   :  { %4853 = vmatpush3.bf16.msra.mxu1 %v3487_v53  ;;  %4847 = vmatpush3.bf16.msra.mxu0 %v3440_v63 }
 0xadf   :  { %4848 = vmatprep.mubr.msk.bf16.mxu0 %vm5109_vm1, %v5108_v16  ;;  %4854 = vmatprep.mubr.msk.bf16.mxu1 %vm5109_vm1, %v5108_v16  ;;  %v3154_v48 = vpack.c.bf16 %v3146_v62, %v3146_v62 }
 0xae0   :  { %4858 = vmatprep.subr.bf16.mxu0 %v5108_v16  ;;  %4864 = vmatprep.subr.bf16.mxu1 %v5108_v16 }
 0xae4   :  { %v5045_v47 = vpop.eup %5044 }
 0xae5   :  { %v3147_v2 = vmul.f32 %v5045_v47, %v5913_v15  ;;  %4849 = vmatmul.mubr.msk.bf16.vlgmr.msra.gmra.mxu0 %vm3059_vm14, %v3154_v48 }
 0xae6   :  { %4859 = vmatpush3.bf16.msra.mxu0 %v3548_v50  ;;  %4860 = vmatprep.mubr.msk.bf16.mxu0 %vm5109_vm1, %v5108_v16 }
 0xae7   :  { %v3155_v3 = vpack.c.bf16 %v3147_v2, %v3147_v2  ;;  %4870 = vmatprep.subr.bf16.mxu0 %v5108_v16 }
 0xae9   :  { %4855 = vmatmul.mubr.msk.bf16.vlgmr.msra.gmra.mxu1 %vm3059_vm14, %v3155_v3 }
 0xaea   :  { %4865 = vmatpush3.bf16.msra.mxu1 %v3594_v57  ;;  %4866 = vmatprep.mubr.msk.bf16.mxu1 %vm5109_vm1, %v5108_v16 }
 0xaeb   :  { %4876 = vmatprep.subr.bf16.mxu1 %v5108_v16 }
 0xb60   :  { %v3244_v6 = vpop.f32.mrf.mxu1 }
 0xb61   :  { %v3197_v13 = vpop.f32.mrf.mxu0  ;;  %v3537_v14 = vpack.c.bf16 %v3244_v6, %v3244_v6 }
 0xb62   :  { %v3536_v17 = vpack.c.bf16 %v3197_v13, %v3197_v13  ;;  %v4820_v18 = vpop.f32.mrf.mxu1 }
 0xb63   :  { %v4814_v1 = vpop.f32.mrf.mxu0  ;;  %4867 = vmatmul.mubr.msk.bf16.vlgmr.msra.gmra.mxu1 %vm542_vm6, %v3537_v14 }
 0xb64   :  { %4861 = vmatmul.mubr.msk.bf16.vlgmr.msra.gmra.mxu0 %vm542_vm6, %v3536_v17  ;;  %v3247_v11 = vpop.f32.mrf.mxu1  ;;  %4877 = vmatpush3.bf16.msra.mxu1 %v3686_v46 }
 0xb65   :  { %v3200_v7 = vpop.f32.mrf.mxu0  ;;  %4871 = vmatpush3.bf16.msra.mxu0 %v3640_v12  ;;  %4872 = vmatprep.mubr.msk.bf16.mxu0 %vm5109_vm1, %v5108_v16 }
 0xb66   :  { %v4821_v23 = vpop.f32.mrf.mxu1  ;;  %4878 = vmatprep.mubr.msk.bf16.mxu1 %vm5109_vm1, %v5108_v16  ;;  %4882 = vmatprep.subr.bf16.mxu0 %v5108_v16 }
 0xb67   :  { %v4815_v8 = vpop.f32.mrf.mxu0  ;;  %4888 = vmatprep.subr.bf16.mxu1 %v5108_v16 }
 0xb69   :  { %v3291_v24 = vpop.f32.mrf.mxu0 }
 0xb6a   :  { %v3538_v26 = vpack.c.bf16 %v3291_v24, %v3291_v24 }
 0xb6b   :  { %v4826_v49 = vpop.f32.mrf.mxu0 }
 0xb6c   :  { %4873 = vmatmul.mubr.msk.bf16.vlgmr.msra.gmra.mxu0 %vm542_vm6, %v3538_v26 }
 0xb6d   :  { %v3294_v10 = vpop.f32.mrf.mxu0  ;;  %4883 = vmatpush3.bf16.msra.mxu0 %v3548_v50  ;;  %4884 = vmatprep.mubr.msk.bf16.mxu0 %vm5109_vm1, %v5108_v16 }
 0xb6e   :  { %4894 = vmatprep.subr.bf16.mxu0 %v5108_v16 }
 0xb6f   :  { %v4827_v15 = vpop.f32.mrf.mxu0 }
 0xb95   :  { %v3338_v9 = vpop.f32.mrf.mxu1 }
 0xb96   :  { %v3539_v31 = vpack.c.bf16 %v3338_v9, %v3338_v9 }
 0xb97   :  { %v4832_v32 = vpop.f32.mrf.mxu1 }
 0xb98   :  { %4879 = vmatmul.mubr.msk.bf16.vlgmr.msra.gmra.mxu1 %vm542_vm6, %v3539_v31 }
 0xb99   :  { %v3341_v33 = vpop.f32.mrf.mxu1  ;;  %4889 = vmatpush3.bf16.msra.mxu1 %v3594_v57  ;;  %4890 = vmatprep.mubr.msk.bf16.mxu1 %vm5109_vm1, %v5108_v16 }
 0xb9a   :  { %4900 = vmatprep.subr.bf16.mxu1 %v5108_v16 }
 0xb9b   :  { %v4833_v34 = vpop.f32.mrf.mxu1 }
 0xb9d   :  { %v3432_v19 = vpop.f32.mrf.mxu1  ;;  %v3385_v22 = vpop.f32.mrf.mxu0 }
 0xb9e   :  { %v3541_v35 = vpack.c.bf16 %v3432_v19, %v3432_v19  ;;  %v3540_v36 = vpack.c.bf16 %v3385_v22, %v3385_v22 }
 0xb9f   :  { %v4844_v27 = vpop.f32.mrf.mxu1  ;;  %v4838_v25 = vpop.f32.mrf.mxu0 }
 0xba0   :  { %4891 = vmatmul.mubr.msk.bf16.vlgmr.msra.gmra.mxu1 %vm542_vm6, %v3541_v35  ;;  %4885 = vmatmul.mubr.msk.bf16.vlgmr.msra.gmra.mxu0 %vm542_vm6, %v3540_v36 }
 0xba1   :  { %v3435_v28 = vpop.f32.mrf.mxu1  ;;  %4901 = vmatpush3.bf16.msra.mxu1 %v3686_v46  ;;  %v3388_v29 = vpop.f32.mrf.mxu0  ;;  %4895 = vmatpush3.bf16.msra.mxu0 %v3640_v12 }
 0xba2   :  { %4896 = vmatprep.mubr.msk.bf16.mxu0 %vm5109_vm1, %v5108_v16  ;;  %4902 = vmatprep.mubr.msk.bf16.mxu1 %vm5109_vm1, %v5108_v16 }
 0xba3   :  { %v4845_v37 = vpop.f32.mrf.mxu1  ;;  %4906 = vmatprep.subr.bf16.mxu0 %v5108_v16  ;;  %v4839_v38 = vpop.f32.mrf.mxu0  ;;  %4914 = vmatprep.subr.bf16.mxu1 %v5108_v16 }
 0xba5   :  { %v3479_v39 = vpop.f32.mrf.mxu0 }
 0xba6   :  { %v3542_v40 = vpack.c.bf16 %v3479_v39, %v3479_v39 }
 0xba7   :  { %v4850_v43 = vpop.f32.mrf.mxu0 }
 0xba8   :  { %4897 = vmatmul.mubr.msk.bf16.vlgmr.msra.gmra.mxu0 %vm542_vm6, %v3542_v40 }
 0xba9   :  { %v3526_v44 = vpop.f32.mrf.mxu1  ;;  %v3482_v20 = vpop.f32.mrf.mxu0  ;;  %4910 = vmatprep.mubr.msk.bf16.mxu0 %vm5109_vm1, %v5108_v16 }
 0xbaa   :  { %v3543_v21 = vpack.c.bf16 %v3526_v44, %v3526_v44 }
 0xbab   :  { %v4856_v45 = vpop.f32.mrf.mxu1  ;;  %v4851_v42 = vpop.f32.mrf.mxu0 }
 0xbac   :  { %4903 = vmatmul.mubr.msk.bf16.vlgmr.msra.gmra.mxu1 %vm542_vm6, %v3543_v21  ;;  %v4960_v42 = vld [vmem:[%s6070_s9 + $0x8] sm:$0xff]  }
 0xbad   :  { %v3529_v51 = vpop.f32.mrf.mxu1  ;;  %4922 = vmatprep.mubr.msk.bf16.mxu1 %vm5109_vm1, %v5108_v16  ;;  %4907 = vmatpush3.bf16.msra.mxu0 %v4960_v42 }
 0xbae   :  { %v4961_v51 = vld [vmem:[%s6070_s9] sm:$0xff]   ;;  %4908 = vmatprep.subr.bf16.mxu0 %v5108_v16  ;;  %s4141_s9 = sld [smem:[#allocation4 + $0x4]] }
 0xbaf   :  { %v4857_v52 = vpop.f32.mrf.mxu1 }
 0xbb0   :  { %v4962_v52 = vld [vmem:[%s6072_s11 + $0x18] sm:$0xff]  }
 0xbb1   :  { %4909 = vmatpush3.bf16.msra.mxu0 %v4961_v51  ;;  %4915 = vmatpush3.bf16.msra.mxu1 %v4962_v52 }
 0xbb2   :  { %4916 = vmatprep.subr.bf16.mxu1 %v5108_v16 }
 0xc23   :  { %v3630_v54 = vpop.f32.mrf.mxu1 }
 0xc24   :  { %v3584_v41 = vpop.f32.mrf.mxu0  ;;  %v3901_v4 = vsel %vm91_vm0, %v3630_v54, 0.0 }
 0xc25   :  { %v4868_v55 = vpop.f32.mrf.mxu1  ;;  %v3900_v50 = vsel %vm91_vm0, %v3584_v41, 0.0 }
 0xc26   :  { %v4862_v56 = vpop.f32.mrf.mxu0  ;;  %v3902_v3 = vadd.f32 %v3901_v4, %v3900_v50 }
 0xc27   :  { %v3633_v59 = vpop.f32.mrf.mxu1 }
 0xc28   :  { %v3587_v60 = vpop.f32.mrf.mxu0 }
 0xc29   :  { %v4869_v53 = vpop.f32.mrf.mxu1 }
 0xc2a   :  { %v4863_v63 = vpop.f32.mrf.mxu0 }
 0xc2c   :  { %v3676_v62 = vpop.f32.mrf.mxu0 }
 0xc2d   :  { %v3903_v2 = vsel %vm91_vm0, %v3676_v62, 0.0 }
 0xc2e   :  { %v4874_v0 = vpop.f32.mrf.mxu0  ;;  %v3904_v57 = vadd.f32 %v3903_v2, %v3902_v3 }
 0xc30   :  { %v3679_v47 = vpop.f32.mrf.mxu0 }
 0xc32   :  { %v4875_v48 = vpop.f32.mrf.mxu0 }
 0xc58   :  { %v3722_v58 = vpop.f32.mrf.mxu1 }
 0xc59   :  { %v3905_v5 = vsel %vm91_vm0, %v3722_v58, 0.0 }
 0xc5a   :  { %v3906_v6 = vadd.f32 %v3905_v5, %v3904_v57  ;;  %v4880_v13 = vpop.f32.mrf.mxu1  ;;  %v3956_v5 = vstv %s4141_s9 }
 0xc5c   :  { %v6008_v14 = vadd.f32 %v3906_v6, %v5576_v30  ;;  %v3725_v46 = vpop.f32.mrf.mxu1 }
 0xc5e   :  { %v4881_v17 = vpop.f32.mrf.mxu1  ;;  %v3916_v18 = vsel %vm91_vm0, %v6008_v14, 0.0 }
 0xc5f   :  { %3917 = vadd.xlane.f32.xlu0 %v3916_v18  ;;  %v3959_v17 = vstv %s4142_s21 }
 0xc60   :  { %v3808_v12 = vpop.f32.mrf.mxu1  ;;  %v3765_v1 = vpop.f32.mrf.mxu0 }
 0xc61   :  { %v3907_v26 = vsel %vm91_vm0, %v3765_v1, 0.0  ;;  %v3908_v49 = vsel %vm91_vm0, %v3808_v12, 0.0 }
 0xc62   :  { %v4892_v11 = vpop.f32.mrf.mxu1  ;;  %v4886_v7 = vpop.f32.mrf.mxu0  ;;  %v3909_v15 = vadd.f32 %v3908_v49, %v3907_v26 }
 0xc63   :  { %v4963_v7 = vld [vmem:[%s6072_s11 + $0x10] sm:$0xff]  }
 0xc64   :  { %v3811_v23 = vpop.f32.mrf.mxu1  ;;  %v3768_v8 = vpop.f32.mrf.mxu0  ;;  %4917 = vmatpush3.bf16.msra.mxu1 %v4963_v7 }
 0xc65   :  { %4918 = vmatprep.subr.bf16.mxu1 %v5108_v16  ;;  %v4964_v23 = vld [vmem:[%s6072_s11 + $0x8] sm:$0xff]   ;;  %v4965_v8 = vld [vmem:[%s6072_s11] sm:$0xff]  }
 0xc66   :  { %v4893_v24 = vpop.f32.mrf.mxu1  ;;  %v4887_v10 = vpop.f32.mrf.mxu0 }
 0xc67   :  { %v4240_v24 = vld [vmem:[%s6071_s10] ss:$0 sm:$0xff]  ;;  %s5113_s10 = smov [#allocation7]  }
 0xc68   :  { %v3851_v30 = vpop.f32.mrf.mxu0  ;;  %4919 = vmatpush3.bf16.msra.mxu1 %v4964_v23  ;;  %s4126_s11 = sshll.u32 %s5113_s10, 4  ;;  %s4127_s11 = int_to_ptr.vmem [resolvable:$true] %s4126_s11 }
 0xc69   :  { %v3910_v9 = vsel %vm91_vm0, %v3851_v30, 0.0  ;;  %4920 = vmatprep.subr.bf16.mxu1 %v5108_v16  ;;  %v4244_v16 = vld [vmem:[%s6073_s12] ss:$0 sm:$0xff]  ;;  %s5080_s28 = scalar_lea.vmem %s4127_s11, 256  ;;  %p5085_p11 = scmp.lt.s32.totalorder %s4127_s11, %s4127_s11 }
 0xc6a   :  { %v4898_v31 = vpop.f32.mrf.mxu0  ;;  %v3911_v32 = vadd.f32 %v3910_v9, %v3909_v15  ;;  %p5081_p10 = scmp.ne.s32.totalorder %s4127_s11, %s5080_s28  ;;  %p5086_p12 = scmp.lt.s32.totalorder %s5080_s28, %s5080_s28 }
 0xc6c   :  { %v3894_v33 = vpop.f32.mrf.mxu1  ;;  %v3854_v34 = vpop.f32.mrf.mxu0  ;;  %4921 = vmatpush3.bf16.msra.mxu1 %v4965_v8  ;;  %p5087_p13 = por %p5086_p12, %p5085_p11 }
 0xc6d   :  { %v3912_v19 = vsel %vm91_vm0, %v3894_v33, 0.0 }
 0xc6e   :  { %v3913_v22 = vadd.f32 %v3912_v19, %v3911_v32  ;;  %v4904_v35 = vpop.f32.mrf.mxu1  ;;  %v4899_v36 = vpop.f32.mrf.mxu0  ;;  %p5088_p0 = pnand %p5087_p13, %p5081_p10 }
 0xc70   :  { %v6017_v27 = vadd.f32 %v3913_v22, %v5587_v61  ;;  %v3897_v25 = vpop.f32.mrf.mxu1 }
 0xc72   :  { %v4905_v28 = vpop.f32.mrf.mxu1  ;;  %v3919_v29 = vsel %vm91_vm0, %v6017_v27, 0.0 }
 0xc73   :  { %3920 = vadd.xlane.f32.xlu1 %v3919_v29 }
 0xce8   :  { %v3918_v37 = vpop.xlane.xlu0 %3917 }
 0xce9   :  { %v3922_v38 = vmul.f32 0.03125, %v3918_v37 }
 0xceb   :  { %v3924_v39 = vsub.f32 %v6008_v14, %v3922_v38 }
 0xced   :  { %v3926_v40 = vmul.f32 %v3924_v39, %v3924_v39 }
 0xcef   :  { %v3928_v43 = vsel %vm91_vm0, %v3926_v40, 0.0 }
 0xcf0   :  { %3929 = vadd.xlane.f32.xlu0 %v3928_v43 }
 0xcfc   :  { %v3921_v44 = vpop.xlane.xlu1 %3920 }
 0xcfd   :  { %v3923_v20 = vmul.f32 0.03125, %v3921_v44 }
 0xcff   :  { %v3925_v21 = vsub.f32 %v6017_v27, %v3923_v20 }
 0xd01   :  { %v3927_v61 = vmul.f32 %v3925_v21, %v3925_v21 }
 0xd03   :  { %v3931_v45 = vsel %vm91_vm0, %v3927_v61, 0.0 }
 0xd04   :  { %3932 = vadd.xlane.f32.xlu0 %v3931_v45 }
 0xd79   :  { %v3930_v54 = vpop.xlane.xlu0 %3929 }
 0xd7a   :  { %v3934_v41 = vmul.f32 0.032258064, %v3930_v54 }
 0xd7c   :  { %5046 = vrsqrt.f32 %v3934_v41  ;;  %vm3938_vm1 = vcmp.eq.f32.partialorder %v3934_v41, inf  ;;  %v3941_v63 = vand.u32 2147483648, %v3934_v41  ;;  %vm3940_vm2 = vcmp.eq.f32.partialorder %v3934_v41, 0.0 }
 0xd89   :  { %v5047_v56 = vpop.eup %5046 }
 0xd8a   :  { %v3937_v60 = vmul.f32 %v5047_v56, %v3934_v41 }
 0xd8c   :  { %v3939_v53 = vsel %vm3938_vm1, %v3934_v41, %v3937_v60 }
 0xd8d   :  { %v3933_v55 = vpop.xlane.xlu0 %3932  ;;  %v3942_v62 = vsel %vm3940_vm2, %v3941_v63, %v3939_v53 }
 0xd8e   :  { %v3935_v59 = vmul.f32 0.032258064, %v3933_v55  ;;  %v3950_v0 = vadd.f32 1e-06, %v3942_v62 }
 0xd90   :  { %5048 = vrsqrt.f32 %v3935_v59  ;;  %vm3945_vm3 = vcmp.eq.f32.partialorder %v3935_v59, inf  ;;  %v3948_v50 = vand.u32 2147483648, %v3935_v59  ;;  %vm3947_vm4 = vcmp.eq.f32.partialorder %v3935_v59, 0.0 }
 0xd91   :  { %5050 = vrcp.f32 %v3950_v0 }
 0xd9d   :  { %v5049_v47 = vpop.eup %5048 }
 0xd9e   :  { %v3944_v48 = vmul.f32 %v5049_v47, %v3935_v59  ;;  %v5051_v57 = vpop.eup %5050 }
 0xd9f   :  { %v3953_v58 = vmul.f32 %v5051_v57, %v3924_v39 }
 0xda0   :  { %v3946_v4 = vsel %vm3945_vm3, %v3935_v59, %v3944_v48 }
 0xda1   :  { %v3949_v2 = vsel %vm3947_vm4, %v3948_v50, %v3946_v4  ;;  %v3957_v46 = vmul.f32 %v3956_v5, %v3953_v58 }
 0xda2   :  { %v3951_v3 = vadd.f32 1e-06, %v3949_v2 }
 0xda3   :  { %v3960_v12 = vadd.f32 %v3959_v17, %v3957_v46 }
 0xda4   :  { %5052 = vrcp.f32 %v3951_v3 }
 0xdb1   :  { %v5053_v6 = vpop.eup %5052 }
 0xdb2   :  { %v3955_v13 = vmul.f32 %v5053_v6, %v3925_v21 }
 0xdb4   :  { %v3958_v18 = vmul.f32 %v3956_v5, %v3955_v13 }
 0xdb6   :  { %v3961_v1 = vadd.f32 %v3959_v17, %v3958_v18 }
 0xdb8   :  { %v3962_v11 = vpack.c.bf16 %v3961_v1, %v3960_v12 }
 0xdba   :  { %4911 = vmatmul.mubr.msk.bf16.vlgmr.msra.gmra.mxu0 %vm91_vm0, %v3962_v11 }
 0xe7a   :  { %v4023_v26 = vpop.f32.mrf.mxu0 }
 0xe7b   :  { %v4024_v10 = vadd.f32 %v4240_v24, %v4023_v26 }
 0xe7c   :  { %v4912_v49 = vpop.f32.mrf.mxu0 }
 0xe7d   :  { %v4030_v31 = vmax.f32 %v4024_v10, 0.0 }
 0xe7e   :  { %v4026_v30 = vpop.f32.mrf.mxu0 }
 0xe7f   :  { %v4027_v15 = vadd.f32 %v4240_v24, %v4026_v30 }
 0xe80   :  { %v4913_v9 = vpop.f32.mrf.mxu0 }
 0xe81   :  { %v4031_v32 = vmax.f32 %v4027_v15, 0.0 }
 0xe83   :  { %v4032_v33 = vpack.c.bf16 %v4031_v32, %v4030_v31 }
 0xe85   :  { %4923 = vmatmul.mubr.msk.bf16.vlgmr.msra.gmra.mxu1 %vm4072_vm5, %v4032_v33 }
 0xf45   :  { %v4110_v34 = vpop.f32.mrf.mxu1 }
 0xf46   :  { %v4111_v19 = vadd.f32 %v4244_v16, %v4110_v34 }
 0xf47   :  { %v4924_v22 = vpop.f32.mrf.mxu1 }
 0xf48   :  { %v4117_v35 = vadd.f32 %v4111_v19, %v6008_v14 }
 0xf49   :  { %v4113_v36 = vpop.f32.mrf.mxu1 }
 0xf4a   :  { %4119 = vst.msk [vmem:[#allocation7] sm:$0xff] %vm91_vm0, %v4117_v35  ;;  %v4114_v25 = vadd.f32 %v4244_v16, %v4113_v36 }
 0xf4b   :  { %v4925_v28 = vpop.f32.mrf.mxu1 }
 0xf4c   :  { %v4118_v29 = vadd.f32 %v4114_v25, %v6017_v27 }
 0xf4e   :  { %4120 = vst.msk [vmem:[#allocation7 + $0x8] sm:$0xff] %vm91_vm0, %v4118_v29 }
 0xf4f   :  { %5091 = shalt.err (!%p5088_p0)
}
 0xf50   :  { %s5114_s12 = smov 128   ;;  %s5115_s4 = smov 8  }
 0xf51   :  { %4132 = dma.vmem_to_hbm [thread:$0]  %s4127_s11, 256, %s6074_s13, [#allocation5], %s5114_s12, %s5114_s12, %s5115_s4  }
 0xf52   :  { %5104 = dma.done.wait [#allocation5], 256  }
 0xf53   :  { %5105 = vsyncadd [#allocation5], 4294967040 }
 0xf54   :  { %4136 = vsyncpa [#allocation5], 1 }
 0xf55   :  { %4137 = vsyncpa [#allocation6], 1 }

</bundles_post_ra>
